<compile_context>
chip_gen: v5e
topology: v5e:2x2
jax: 0.10.0
libtpu: 0.0.40
codegen_flags: <defaults>
</compile_context>

<pallas_src>
import jax
import jax.numpy as jnp
from jax.experimental import pallas as pl
from jax.experimental.pallas import tpu as pltpu
from functools import partial


def sru_kernel(x_ref, gw_ref, bw_ref, info_ref, p_ref, o_ref, *, group_num, eps):
    nb, C, HW = x_ref.shape
    half = C // 2
    n = (C // group_num) * HW                  # elements per group (per image)
    inv_n = 1.0 / n
    inv_nm1 = 1.0 / max(n - 1, 1)              # unbiased (n-1), guard n == 1

    gw = gw_ref[...]                           # (C,1)  gamma * softmax(gamma)
    bw = bw_ref[...]                           # (C,1)  beta  * softmax(gamma)
    info = info_ref[...]                       # (C,1)  0/1 info mask
    P = p_ref[...]                             # (C,C)  same-group indicator
    # hoist the lane-broadcast of the loop-invariant mask out of the nb loop
    info_b = jnp.broadcast_to(info, (C, HW))

    for i in range(nb):                        # nb is small & static
        x = x_ref[i].astype(jnp.float32)       # (C, HW) f32

        # --- one-pass group statistics: two lane reductions + two tiny matvecs ---
        s1 = jnp.sum(x, axis=1, keepdims=True)             # (C,1) per-channel sum
        s2 = jnp.sum(x * x, axis=1, keepdims=True)         # (C,1) per-channel sumsq
        gsum = jnp.dot(P, s1, preferred_element_type=jnp.float32)    # group sum per channel
        gsumsq = jnp.dot(P, s2, preferred_element_type=jnp.float32)  # group sumsq per channel
        mean = gsum * inv_n
        var = jnp.maximum((gsumsq - gsum * mean) * inv_nm1, 0.0)
        inv_std = 1.0 / (jnp.sqrt(var) + eps)              # exact, only (C,1) elements

        # fold everything into one per-channel scale / offset
        a = gw * inv_std                                   # (C,1)
        b = bw - mean * a                                  # (C,1)

        # --- hot path over (C, HW): FMA + sigmoid (EUP) + 2 mul + sub + roll (XLU) + add
        rew = jax.nn.sigmoid(x * a + b)
        t = rew * x
        x1 = info_b * t                                    # info-masked part
        x2 = t - x1                                        # non-info part
        o_ref[i] = (x1 + pltpu.roll(x2, shift=half, axis=0)).astype(o_ref.dtype)


def sru_forward(x, gamma, beta, *, group_num=16, gate_treshold=0.5, eps=1e-10,
                block_batch=None):
    N, C, H, W = x.shape
    HW = H * W
    assert C % group_num == 0 and C % 2 == 0
    xr = x.reshape(N, C, HW)

    # ---- batch-invariant per-channel constants (parameter-only glue, f32) ----
    g = gamma.reshape(C).astype(jnp.float32)
    b = beta.reshape(C).astype(jnp.float32)
    wg = jax.nn.softmax(g, axis=0)                         # softmax over channel dim
    gw = (g * wg).reshape(C, 1)                            # folded into sigmoid scale
    bw = (b * wg).reshape(C, 1)                            # folded into sigmoid offset
    info = (wg > gate_treshold).astype(jnp.float32).reshape(C, 1)

    # same-group indicator matrix P[i,j] = 1 iff channels i,j share a group
    cg = C // group_num
    ids = jnp.arange(C) // cg
    P = (ids[:, None] == ids[None, :]).astype(jnp.float32)  # (C, C)

    # ---- block-batch selection: ~4 MiB blocks, divisor of N, bounded unroll ----
    if block_batch is None:
        img_bytes = C * HW * x.dtype.itemsize
        nb = max(1, min(N, 16, (4 * 1024 * 1024) // max(img_bytes, 1)))
        while N % nb:
            nb -= 1
    else:
        nb = block_batch
        assert N % nb == 0
    grid = (N // nb,)

    # in + out blocks are double-buffered; leave headroom, stay under v7x's 64 MiB VMEM
    # TODO(synk): for very large single images (C*H*W >> 4 MiB) split the HW axis
    # with a two-pass stats/apply structure instead of relying on one big block.
    block_bytes = nb * C * HW * x.dtype.itemsize
    vmem_limit = int(min(56 * 1024 * 1024,
                         max(32 * 1024 * 1024, 4 * block_bytes + (8 << 20))))

    kernel = partial(sru_kernel, group_num=group_num, eps=eps)
    out = pl.pallas_call(
        kernel,
        out_shape=jax.ShapeDtypeStruct((N, C, HW), x.dtype),
        grid_spec=pltpu.PrefetchScalarGridSpec(
            num_scalar_prefetch=0,
            grid=grid,
            in_specs=[
                pl.BlockSpec((nb, C, HW), lambda n: (n, 0, 0)),
                pl.BlockSpec((C, 1), lambda n: (0, 0)),
                pl.BlockSpec((C, 1), lambda n: (0, 0)),
                pl.BlockSpec((C, 1), lambda n: (0, 0)),
                pl.BlockSpec((C, C), lambda n: (0, 0)),
            ],
            out_specs=pl.BlockSpec((nb, C, HW), lambda n: (n, 0, 0)),
        ),
        compiler_params=pltpu.CompilerParams(
            dimension_semantics=("parallel",),
            vmem_limit_bytes=vmem_limit),
    )(xr, gw, bw, info, P)
    return out.reshape(N, C, H, W)


def sru_reference(x, gamma, beta, *, group_num=16, gate_treshold=0.5, eps=1e-10):
    """Pure-JAX mirror of the PyTorch forward, for verification."""
    N, C, H, W = x.shape
    xv = x.reshape(N, group_num, -1)
    mean = xv.mean(axis=2, keepdims=True)
    std = jnp.sqrt(jnp.sum((xv - mean) ** 2, axis=2, keepdims=True)
                   / (xv.shape[2] - 1))
    xn = ((xv - mean) / (std + eps)).reshape(N, C, H, W)
    gn_x = xn * gamma + beta
    w_gamma = jax.nn.softmax(gamma, axis=0)
    rew = jax.nn.sigmoid(gn_x * w_gamma)
    info = w_gamma > gate_treshold
    x1 = info * rew * x
    x2 = (~info) * rew * x
    half = C // 2
    return jnp.concatenate([x1[:, :half] + x2[:, half:],
                            x1[:, half:] + x2[:, :half]], axis=1)


if __name__ == "__main__":
    key = jax.random.PRNGKey(0)
    kx, kg = jax.random.split(key)

    N, C, H, W = 2, 32, 16, 16            # oup_channels=32, group_num=16
    group_num = 16

    x = jax.random.normal(kx, (N, C, H, W), dtype=jnp.float32)
    gamma = jax.random.normal(kg, (C, 1, 1), dtype=jnp.float32)  # nn.Parameter(torch.randn(C,1,1))
    beta = jnp.zeros((C, 1, 1), dtype=jnp.float32)               # nn.Parameter(torch.zeros(C,1,1))

    out = sru_forward(x, gamma, beta, group_num=group_num)
    out = jax.block_until_ready(out)

    ref = sru_reference(x, gamma, beta, group_num=group_num)
    assert out.shape == (N, C, H, W)
    assert jnp.allclose(out, ref, atol=1e-4, rtol=1e-4), "mismatch vs reference"

    print("KERNEL_OK")
</pallas_src>

<mosaic_0001>
module attributes {stable_mosaic.version = 11 : i64} {
  func.func @sru_kernel(%arg0: i32, %arg1: memref<2x32x256xf32, #tpu.memory_space<vmem>>, %arg2: memref<32x1xf32, #tpu.memory_space<vmem>>, %arg3: memref<32x1xf32, #tpu.memory_space<vmem>>, %arg4: memref<32x1xf32, #tpu.memory_space<vmem>>, %arg5: memref<32x32xf32, #tpu.memory_space<vmem>>, %arg6: memref<2x32x256xf32, #tpu.memory_space<vmem>>) attributes {dimension_semantics = [#tpu.dimension_semantics<parallel>], iteration_bounds = array<i64: 1>, scalar_prefetch = 0 : i64, scratch_operands = 0 : i64, tpu.core_type = #tpu.core_type<tc>, window_params = [{transform_indices = @transform_0, window_bounds = array<i64: 2, 32, 256>}, {pipeline_mode = #tpu.pipeline_mode<synchronous>, transform_indices = @transform_1, window_bounds = array<i64: 32, 1>}, {pipeline_mode = #tpu.pipeline_mode<synchronous>, transform_indices = @transform_2, window_bounds = array<i64: 32, 1>}, {pipeline_mode = #tpu.pipeline_mode<synchronous>, transform_indices = @transform_3, window_bounds = array<i64: 32, 1>}, {pipeline_mode = #tpu.pipeline_mode<synchronous>, transform_indices = @transform_4, window_bounds = array<i64: 32, 32>}, {transform_indices = @transform_5, window_bounds = array<i64: 2, 32, 256>}]} {
    %c0 = arith.constant 0 : index
    %c0_0 = arith.constant 0 : index
    %0 = vector.load %arg2[%c0, %c0_0] : memref<32x1xf32, #tpu.memory_space<vmem>>, vector<32x1xf32>
    %c0_1 = arith.constant 0 : index
    %c0_2 = arith.constant 0 : index
    %1 = vector.load %arg3[%c0_1, %c0_2] : memref<32x1xf32, #tpu.memory_space<vmem>>, vector<32x1xf32>
    %c0_3 = arith.constant 0 : index
    %c0_4 = arith.constant 0 : index
    %2 = vector.load %arg4[%c0_3, %c0_4] : memref<32x1xf32, #tpu.memory_space<vmem>>, vector<32x1xf32>
    %c0_5 = arith.constant 0 : index
    %c0_6 = arith.constant 0 : index
    %3 = vector.load %arg5[%c0_5, %c0_6] : memref<32x32xf32, #tpu.memory_space<vmem>>, vector<32x32xf32>
    %4 = vector.shape_cast %2 : vector<32x1xf32> to vector<32x1xf32>
    %5 = vector.broadcast %4 : vector<32x1xf32> to vector<32x256xf32>
    %c0_7 = arith.constant 0 : index
    %c0_8 = arith.constant 0 : index
    %c0_9 = arith.constant 0 : index
    %6 = vector.load %arg1[%c0_7, %c0_8, %c0_9] : memref<2x32x256xf32, #tpu.memory_space<vmem>>, vector<1x32x256xf32>
    %7 = vector.shape_cast %6 : vector<1x32x256xf32> to vector<32x256xf32>
    %cst = arith.constant dense<0.000000e+00> : vector<32xf32>
    %8 = vector.multi_reduction <add>, %7, %cst [1] : vector<32x256xf32> to vector<32xf32>
    %9 = vector.shape_cast %8 : vector<32xf32> to vector<32x1xf32>
    %10 = arith.mulf %7, %7 : vector<32x256xf32>
    %cst_10 = arith.constant dense<0.000000e+00> : vector<32xf32>
    %11 = vector.multi_reduction <add>, %10, %cst_10 [1] : vector<32x256xf32> to vector<32xf32>
    %12 = vector.shape_cast %11 : vector<32xf32> to vector<32x1xf32>
    %cst_11 = arith.constant dense<0.000000e+00> : vector<32x1xf32>
    %13 = tpu.matmul %3, %9, %cst_11 {dimension_numbers = #tpu.dot_dimension_numbers<[1], [0], [0], [1], [0, 0, 1, 1], [], []>} : vector<32x32xf32>, vector<32x1xf32>, vector<32x1xf32> -> vector<32x1xf32>
    %cst_12 = arith.constant dense<0.000000e+00> : vector<32x1xf32>
    %14 = tpu.matmul %3, %12, %cst_12 {dimension_numbers = #tpu.dot_dimension_numbers<[1], [0], [0], [1], [0, 0, 1, 1], [], []>} : vector<32x32xf32>, vector<32x1xf32>, vector<32x1xf32> -> vector<32x1xf32>
    %cst_13 = arith.constant 0.001953125 : f32
    %15 = vector.broadcast %cst_13 : f32 to vector<32x1xf32>
    %16 = arith.mulf %13, %15 : vector<32x1xf32>
    %17 = arith.mulf %13, %16 : vector<32x1xf32>
    %18 = arith.subf %14, %17 : vector<32x1xf32>
    %cst_14 = arith.constant 0.00195694715 : f32
    %19 = vector.broadcast %cst_14 : f32 to vector<32x1xf32>
    %20 = arith.mulf %18, %19 : vector<32x1xf32>
    %cst_15 = arith.constant 0.000000e+00 : f32
    %21 = vector.broadcast %cst_15 : f32 to vector<32x1xf32>
    %22 = arith.maximumf %20, %21 : vector<32x1xf32>
    %23 = math.sqrt %22 : vector<32x1xf32>
    %cst_16 = arith.constant 1.000000e-10 : f32
    %24 = vector.broadcast %cst_16 : f32 to vector<32x1xf32>
    %25 = arith.addf %23, %24 : vector<32x1xf32>
    %cst_17 = arith.constant 1.000000e+00 : f32
    %26 = vector.broadcast %cst_17 : f32 to vector<32x1xf32>
    %27 = arith.divf %26, %25 : vector<32x1xf32>
    %28 = arith.mulf %0, %27 : vector<32x1xf32>
    %29 = arith.mulf %16, %28 : vector<32x1xf32>
    %30 = arith.subf %1, %29 : vector<32x1xf32>
    %31 = vector.broadcast %28 : vector<32x1xf32> to vector<32x256xf32>
    %32 = arith.mulf %7, %31 : vector<32x256xf32>
    %33 = vector.broadcast %30 : vector<32x1xf32> to vector<32x256xf32>
    %34 = arith.addf %32, %33 : vector<32x256xf32>
    %35 = arith.negf %34 : vector<32x256xf32>
    %36 = math.exp %35 : vector<32x256xf32>
    %cst_18 = arith.constant 1.000000e+00 : f32
    %37 = vector.broadcast %cst_18 : f32 to vector<32x256xf32>
    %38 = arith.addf %37, %36 : vector<32x256xf32>
    %39 = arith.divf %37, %38 : vector<32x256xf32>
    %40 = arith.mulf %39, %7 : vector<32x256xf32>
    %41 = arith.mulf %5, %40 : vector<32x256xf32>
    %42 = arith.subf %40, %41 : vector<32x256xf32>
    %c16_i32 = arith.constant 16 : i32
    %43 = tpu.dynamic_rotate %42 by %c16_i32 dim 0 : vector<32x256xf32>, i32 -> vector<32x256xf32>
    %44 = arith.addf %41, %43 : vector<32x256xf32>
    %c0_19 = arith.constant 0 : index
    %c0_20 = arith.constant 0 : index
    %c0_21 = arith.constant 0 : index
    %45 = vector.load %arg6[%c0_19, %c0_20, %c0_21] : memref<2x32x256xf32, #tpu.memory_space<vmem>>, vector<1x32x256xf32>
    %46 = vector.shape_cast %45 : vector<1x32x256xf32> to vector<32x256xf32>
    %47 = vector.shape_cast %44 : vector<32x256xf32> to vector<1x32x256xf32>
    tpu.vector_store %arg6[%c0_19, %c0_20, %c0_21], %47 {strides = array<i32>} : memref<2x32x256xf32, #tpu.memory_space<vmem>>, vector<1x32x256xf32>,
    %c1 = arith.constant 1 : index
    %c0_22 = arith.constant 0 : index
    %c0_23 = arith.constant 0 : index
    %48 = vector.load %arg1[%c1, %c0_22, %c0_23] : memref<2x32x256xf32, #tpu.memory_space<vmem>>, vector<1x32x256xf32>
    %49 = vector.shape_cast %48 : vector<1x32x256xf32> to vector<32x256xf32>
    %cst_24 = arith.constant dense<0.000000e+00> : vector<32xf32>
    %50 = vector.multi_reduction <add>, %49, %cst_24 [1] : vector<32x256xf32> to vector<32xf32>
    %51 = vector.shape_cast %50 : vector<32xf32> to vector<32x1xf32>
    %52 = arith.mulf %49, %49 : vector<32x256xf32>
    %cst_25 = arith.constant dense<0.000000e+00> : vector<32xf32>
    %53 = vector.multi_reduction <add>, %52, %cst_25 [1] : vector<32x256xf32> to vector<32xf32>
    %54 = vector.shape_cast %53 : vector<32xf32> to vector<32x1xf32>
    %cst_26 = arith.constant dense<0.000000e+00> : vector<32x1xf32>
    %55 = tpu.matmul %3, %51, %cst_26 {dimension_numbers = #tpu.dot_dimension_numbers<[1], [0], [0], [1], [0, 0, 1, 1], [], []>} : vector<32x32xf32>, vector<32x1xf32>, vector<32x1xf32> -> vector<32x1xf32>
    %cst_27 = arith.constant dense<0.000000e+00> : vector<32x1xf32>
    %56 = tpu.matmul %3, %54, %cst_27 {dimension_numbers = #tpu.dot_dimension_numbers<[1], [0], [0], [1], [0, 0, 1, 1], [], []>} : vector<32x32xf32>, vector<32x1xf32>, vector<32x1xf32> -> vector<32x1xf32>
    %cst_28 = arith.constant 0.001953125 : f32
    %57 = vector.broadcast %cst_28 : f32 to vector<32x1xf32>
    %58 = arith.mulf %55, %57 : vector<32x1xf32>
    %59 = arith.mulf %55, %58 : vector<32x1xf32>
    %60 = arith.subf %56, %59 : vector<32x1xf32>
    %cst_29 = arith.constant 0.00195694715 : f32
    %61 = vector.broadcast %cst_29 : f32 to vector<32x1xf32>
    %62 = arith.mulf %60, %61 : vector<32x1xf32>
    %cst_30 = arith.constant 0.000000e+00 : f32
    %63 = vector.broadcast %cst_30 : f32 to vector<32x1xf32>
    %64 = arith.maximumf %62, %63 : vector<32x1xf32>
    %65 = math.sqrt %64 : vector<32x1xf32>
    %cst_31 = arith.constant 1.000000e-10 : f32
    %66 = vector.broadcast %cst_31 : f32 to vector<32x1xf32>
    %67 = arith.addf %65, %66 : vector<32x1xf32>
    %cst_32 = arith.constant 1.000000e+00 : f32
    %68 = vector.broadcast %cst_32 : f32 to vector<32x1xf32>
    %69 = arith.divf %68, %67 : vector<32x1xf32>
    %70 = arith.mulf %0, %69 : vector<32x1xf32>
    %71 = arith.mulf %58, %70 : vector<32x1xf32>
    %72 = arith.subf %1, %71 : vector<32x1xf32>
    %73 = vector.broadcast %70 : vector<32x1xf32> to vector<32x256xf32>
    %74 = arith.mulf %49, %73 : vector<32x256xf32>
    %75 = vector.broadcast %72 : vector<32x1xf32> to vector<32x256xf32>
    %76 = arith.addf %74, %75 : vector<32x256xf32>
    %77 = arith.negf %76 : vector<32x256xf32>
    %78 = math.exp %77 : vector<32x256xf32>
    %cst_33 = arith.constant 1.000000e+00 : f32
    %79 = vector.broadcast %cst_33 : f32 to vector<32x256xf32>
    %80 = arith.addf %79, %78 : vector<32x256xf32>
    %81 = arith.divf %79, %80 : vector<32x256xf32>
    %82 = arith.mulf %81, %49 : vector<32x256xf32>
    %83 = arith.mulf %5, %82 : vector<32x256xf32>
    %84 = arith.subf %82, %83 : vector<32x256xf32>
    %c16_i32_34 = arith.constant 16 : i32
    %85 = tpu.dynamic_rotate %84 by %c16_i32_34 dim 0 : vector<32x256xf32>, i32 -> vector<32x256xf32>
    %86 = arith.addf %83, %85 : vector<32x256xf32>
    %c1_35 = arith.constant 1 : index
    %c0_36 = arith.constant 0 : index
    %c0_37 = arith.constant 0 : index
    %87 = vector.load %arg6[%c1_35, %c0_36, %c0_37] : memref<2x32x256xf32, #tpu.memory_space<vmem>>, vector<1x32x256xf32>
    %88 = vector.shape_cast %87 : vector<1x32x256xf32> to vector<32x256xf32>
    %89 = vector.shape_cast %86 : vector<32x256xf32> to vector<1x32x256xf32>
    tpu.vector_store %arg6[%c1_35, %c0_36, %c0_37], %89 {strides = array<i32>} : memref<2x32x256xf32, #tpu.memory_space<vmem>>, vector<1x32x256xf32>,
    return
  }
  func.func @transform_0(%arg0: i32) -> (i32, i32, i32) {
    %c0_i32 = arith.constant 0 : i32
    %c0_i32_0 = arith.constant 0 : i32
    %c0_i32_1 = arith.constant 0 : i32
    return %arg0, %c0_i32, %c0_i32_0 : i32, i32, i32
  }
  func.func @transform_1(%arg0: i32) -> (i32, i32) {
    %c0_i32 = arith.constant 0 : i32
    %c0_i32_0 = arith.constant 0 : i32
    %c0_i32_1 = arith.constant 0 : i32
    return %c0_i32, %c0_i32_0 : i32, i32
  }
  func.func @transform_2(%arg0: i32) -> (i32, i32) {
    %c0_i32 = arith.constant 0 : i32
    %c0_i32_0 = arith.constant 0 : i32
    %c0_i32_1 = arith.constant 0 : i32
    return %c0_i32, %c0_i32_0 : i32, i32
  }
  func.func @transform_3(%arg0: i32) -> (i32, i32) {
    %c0_i32 = arith.constant 0 : i32
    %c0_i32_0 = arith.constant 0 : i32
    %c0_i32_1 = arith.constant 0 : i32
    return %c0_i32, %c0_i32_0 : i32, i32
  }
  func.func @transform_4(%arg0: i32) -> (i32, i32) {
    %c0_i32 = arith.constant 0 : i32
    %c0_i32_0 = arith.constant 0 : i32
    %c0_i32_1 = arith.constant 0 : i32
    return %c0_i32, %c0_i32_0 : i32, i32
  }
  func.func @transform_5(%arg0: i32) -> (i32, i32, i32) {
    %c0_i32 = arith.constant 0 : i32
    %c0_i32_0 = arith.constant 0 : i32
    %c0_i32_1 = arith.constant 0 : i32
    return %arg0, %c0_i32, %c0_i32_0 : i32, i32, i32
  }
}

</mosaic_0001>

<bundles_post_ra>
// kernel: tpu_custom_call.1
= control target key start
LH: loop header
LB: loop body
LE: loop exit
PB: predicated region body
PF: predicated region fallthrough
CT: control target
= control target key end

     0   :  { %10 = vsyncpa [#allocation3], 0  ;;  %s2098_s0 = inlined_call_operand.hbm [shape: f32[2,32,256], index: 0, kind: input, shape index: {}]   ;;  %s2099_s1 = inlined_call_operand.vmem [shape: f32[32,1], index: 1, kind: input, shape index: {}]   ;;  %s2100_s2 = inlined_call_operand.vmem [shape: f32[32,1], index: 2, kind: input, shape index: {}]   ;;  %s2101_s3 = inlined_call_operand.vmem [shape: f32[32,1], index: 3, kind: input, shape index: {}]   ;;  %s2102_s4 = inlined_call_operand.vmem [shape: f32[32,32], index: 4, kind: input, shape index: {}]   ;;  %s2103_s5 = inlined_call_operand.hbm [shape: f32[2,32,256], index: 5, kind: output, shape index: {}]  }
   0x1   :  { %11 = vsyncpa [#allocation4], 0  ;;  %s16_s20 = sshll.u32 %s2098_s0, 4  ;;  %s1291_s21 = smov [#allocation2]   ;;  %s17_s20 = int_to_ptr.hbm [resolvable:$true] %s16_s20 }
   0x2   :  { %s18_s22 = sshll.u32 %s1291_s21, 4  ;;  %s1292_s23 = smov 256   ;;  %s19_s22 = int_to_ptr.vmem [resolvable:$true] %s18_s22 }
   0x3   :  { %s1293_s24 = smov 16  }
   0x4   :  { %24 = dma.hbm_to_vmem [thread:$0]  %s17_s20, 2048, %s19_s22, [#allocation3], %s1292_s23, %s1292_s23, %s1293_s24  }
   0x5   :  { %1287 = dma.done.wait [#allocation3], 2048  }
   0x6   :  { %1288 = vsyncadd [#allocation3], 4294965248  ;;  %v583_v0 = vld [vmem:[#allocation2 + $0x70] sm:$0xff]  ;;  %v584_v1 = vld [vmem:[#allocation2 + $0x78] sm:$0xff]  ;;  %vm113_vm0 = vcmask 261120  }
   0x7   :  { %v79_v2 = vld [vmem:[#allocation2 + $0x30] sm:$0xff]  ;;  %v594_v3 = vadd.f32 %v584_v1, %v583_v0  ;;  %v80_v4 = vld [vmem:[#allocation2 + $0x38] sm:$0xff]  ;;  %v581_v9 = vld [vmem:[#allocation2 + $0x60] sm:$0xff]  ;;  %v603_v11 = vmul.f32 %v583_v0, %v583_v0  ;;  %v604_v12 = vmul.f32 %v584_v1, %v584_v1 }
   0x8   :  { %v579_v5 = vld [vmem:[#allocation2 + $0x50] sm:$0xff]  ;;  %v580_v6 = vld [vmem:[#allocation2 + $0x58] sm:$0xff]  ;;  %v90_v7 = vadd.f32 %v80_v4, %v79_v2  ;;  %v582_v10 = vld [vmem:[#allocation2 + $0x68] sm:$0xff]  ;;  %v601_v18 = vmul.f32 %v581_v9, %v581_v9  ;;  %v99_v27 = vmul.f32 %v79_v2, %v79_v2  ;;  %v100_v32 = vmul.f32 %v80_v4, %v80_v4 }
   0x9   :  { %v588_v8 = vadd.f32 %v580_v6, %v579_v5  ;;  %595 = vadd.xlane.f32.xlu0 %v594_v3  ;;  %v1332_v13 = vld [vmem:[#allocation2 + $0x40] sm:$0xff]  ;;  %v1334_v14 = vld [vmem:[#allocation2 + $0x48] sm:$0xff]  ;;  %v591_v15 = vadd.f32 %v582_v10, %v581_v9  ;;  %v614_v17 = vadd.f32 %v604_v12, %v603_v11  ;;  %v602_v19 = vmul.f32 %v582_v10, %v582_v10  ;;  %v1348_v30 = vld [vmem:[#allocation2 + $0x10] sm:$0xff] }
   0xa   :  { %91 = vadd.xlane.f32.xlu2 %v90_v7  ;;  %v585_v16 = vadd.f32 %v1334_v14, %v1332_v13  ;;  %v599_v20 = vmul.f32 %v579_v5, %v579_v5  ;;  %v600_v21 = vmul.f32 %v580_v6, %v580_v6  ;;  %v1338_v22 = vld [vmem:[#allocation2 + $0x20] sm:$0xff]  ;;  %v1340_v23 = vld [vmem:[#allocation2 + $0x28] sm:$0xff]  ;;  %v597_v28 = vmul.f32 %v1332_v13, %v1332_v13  ;;  %v1350_v31 = vld [vmem:[#allocation2 + $0x18] sm:$0xff] }
   0xb   :  { %589 = vadd.xlane.f32.xlu1 %v588_v8  ;;  %v611_v24 = vadd.f32 %v602_v19, %v601_v18  ;;  %v87_v26 = vadd.f32 %v1340_v23, %v1338_v22  ;;  %v598_v29 = vmul.f32 %v1334_v14, %v1334_v14  ;;  %v84_v33 = vadd.f32 %v1350_v31, %v1348_v30  ;;  %v1356_v37 = vld [vmem:[#allocation2] sm:$0xff]  ;;  %v1358_v38 = vld [vmem:[#allocation2 + $0x8] sm:$0xff]  ;;  %v51_v62 = vld [vmem:[%s2102_s4 + $0x10] sm:$0xff] }
   0xc   :  { %v608_v25 = vadd.f32 %v600_v21, %v599_v20  ;;  %v110_v35 = vadd.f32 %v100_v32, %v99_v27  ;;  %v97_v36 = vmul.f32 %v1338_v22, %v1338_v22  ;;  %v98_v39 = vmul.f32 %v1340_v23, %v1340_v23  ;;  %v49_v54 = vld [vmem:[%s2102_s4] sm:$0xff]  ;;  %v50_v58 = vld [vmem:[%s2102_s4 + $0x8] sm:$0xff]  ;;  %v52_v2 = vld [vmem:[%s2102_s4 + $0x18] sm:$0xff]  ;;  %s1074_s4 = sshll.u32 %s2103_s5, 4  ;;  %s1075_s4 = int_to_ptr.hbm [resolvable:$true] %s1074_s4 }
   0xd   :  { %v605_v34 = vadd.f32 %v598_v29, %v597_v28  ;;  %v95_v40 = vmul.f32 %v1348_v30, %v1348_v30  ;;  %v96_v41 = vmul.f32 %v1350_v31, %v1350_v31  ;;  %v81_v42 = vadd.f32 %v1358_v38, %v1356_v37 }
   0xe   :  { %v107_v43 = vadd.f32 %v98_v39, %v97_v36  ;;  %v93_v45 = vmul.f32 %v1356_v37, %v1356_v37  ;;  %v94_v46 = vmul.f32 %v1358_v38, %v1358_v38  ;;  %v1294_v21 = vmov 0  }
   0xf   :  { %v104_v44 = vadd.f32 %v96_v41, %v95_v40  ;;  %1126 = vset.pattern.permute.xlu0 %v1294_v21  ;;  %1125 = vset.pattern.permute.xlu2 %v1294_v21 }
  0x10   :  { %v101_v47 = vadd.f32 %v94_v46, %v93_v45  ;;  %1124 = vset.pattern.permute.xlu1 %v1294_v21 }
  0x11   :  { %592 = vadd.xlane.f32.xlu0 %v591_v15 }
  0x12   :  { %586 = vadd.xlane.f32.xlu2 %v585_v16 }
  0x13   :  { %615 = vadd.xlane.f32.xlu1 %v614_v17 }
  0x19   :  { %612 = vadd.xlane.f32.xlu0 %v611_v24  ;;  %v47_v24 = vld [vmem:[%s2101_s3 + $0x10] sm:$0xff] }
  0x1a   :  { %609 = vadd.xlane.f32.xlu2 %v608_v25 }
  0x1b   :  { %88 = vadd.xlane.f32.xlu1 %v87_v26 }
  0x21   :  { %85 = vadd.xlane.f32.xlu0 %v84_v33 }
  0x22   :  { %606 = vadd.xlane.f32.xlu2 %v605_v34 }
  0x23   :  { %111 = vadd.xlane.f32.xlu1 %v110_v35 }
  0x29   :  { %82 = vadd.xlane.f32.xlu0 %v81_v42 }
  0x2a   :  { %105 = vadd.xlane.f32.xlu2 %v104_v44 }
  0x2b   :  { %108 = vadd.xlane.f32.xlu1 %v107_v43 }
  0x31   :  { %102 = vadd.xlane.f32.xlu0 %v101_v47 }
  0x45   :  { %65 = vperm.xlu0 %1126, %v47_v24  }
  0x7c   :  { %v596_v48 = vpop.xlane.xlu0 %595 }
  0x7d   :  { %v92_v49 = vpop.xlane.xlu2 %91  ;;  %629 = vmatpush.msra.mxu2 %v596_v48 }
  0x7e   :  { %v590_v50 = vpop.xlane.xlu1 %589  ;;  %138 = vmatpush.msra.mxu0 %v92_v49 }
  0x84   :  { %v593_v51 = vpop.xlane.xlu0 %592 }
  0x85   :  { %v587_v52 = vpop.xlane.xlu2 %586  ;;  %630 = vmatpush.msra.mxu2 %v593_v51 }
  0x86   :  { %v616_v53 = vpop.xlane.xlu1 %615 }
  0x87   :  { %658 = vmatpush.msra.mxu3 %v616_v53  ;;  %631 = vmatpush.msra.mxu2 %v590_v50 }
  0x89   :  { %632 = vmatpush.msra.mxu2 %v587_v52 }
  0x8a   :  { %1103 = vmatmul.msk.f32.vlgmr.msra.gmra.mxu2 %vm113_vm0, %v49_v54 }
  0x8c   :  { %v613_v55 = vpop.xlane.xlu0 %612 }
  0x8d   :  { %v610_v56 = vpop.xlane.xlu2 %609  ;;  %659 = vmatpush.msra.mxu3 %v613_v55 }
  0x8e   :  { %v89_v57 = vpop.xlane.xlu1 %88 }
  0x8f   :  { %139 = vmatpush.msra.mxu0 %v89_v57  ;;  %660 = vmatpush.msra.mxu3 %v610_v56 }
  0x92   :  { %1104 = vmatmul.msk.f32.gmra.mxu2 %vm113_vm0, %v50_v58 }
  0x94   :  { %v86_v59 = vpop.xlane.xlu0 %85 }
  0x95   :  { %v607_v60 = vpop.xlane.xlu2 %606  ;;  %140 = vmatpush.msra.mxu0 %v86_v59  ;;  %v46_v59 = vld [vmem:[%s2101_s3 + $0x8] sm:$0xff] }
  0x96   :  { %v112_v61 = vpop.xlane.xlu1 %111  ;;  %661 = vmatpush.msra.mxu3 %v607_v60  ;;  %v45_v60 = vld [vmem:[%s2101_s3] sm:$0xff]  ;;  %60 = vperm.xlu2 %1125, %v46_v59  }
  0x97   :  { %167 = vmatpush.msra.mxu1 %v112_v61  ;;  %1107 = vmatmul.msk.f32.vlgmr.msra.gmra.mxu3 %vm113_vm0, %v49_v54 }
  0x98   :  { %55 = vperm.xlu1 %1124, %v45_v60  }
  0x9a   :  { %1105 = vmatmul.msk.f32.gmra.mxu2 %vm113_vm0, %v51_v62 }
  0x9c   :  { %v83_v63 = vpop.xlane.xlu0 %82 }
  0x9d   :  { %141 = vmatpush.msra.mxu0 %v83_v63  ;;  %v106_v1 = vpop.xlane.xlu2 %105 }
  0x9e   :  { %v109_v0 = vpop.xlane.xlu1 %108  ;;  %1087 = vmatmul.msk.f32.vlgmr.msra.gmra.mxu0 %vm113_vm0, %v49_v54 }
  0x9f   :  { %168 = vmatpush.msra.mxu1 %v109_v0  ;;  %1108 = vmatmul.msk.f32.gmra.mxu3 %vm113_vm0, %v50_v58 }
  0xa1   :  { %169 = vmatpush.msra.mxu1 %v106_v1 }
  0xa2   :  { %1106 = vmatmul.msk.f32.gmra.mxu2 %vm113_vm0, %v52_v2 }
  0xa4   :  { %v103_v3 = vpop.xlane.xlu0 %102 }
  0xa5   :  { %170 = vmatpush.msra.mxu1 %v103_v3 }
  0xa6   :  { %1091 = vmatmul.msk.f32.vlgmr.msra.gmra.mxu1 %vm113_vm0, %v49_v54  ;;  %1088 = vmatmul.msk.f32.gmra.mxu0 %vm113_vm0, %v50_v58 }
  0xa7   :  { %1109 = vmatmul.msk.f32.gmra.mxu3 %vm113_vm0, %v51_v62 }
  0xae   :  { %1092 = vmatmul.msk.f32.gmra.mxu1 %vm113_vm0, %v50_v58  ;;  %1089 = vmatmul.msk.f32.gmra.mxu0 %vm113_vm0, %v51_v62 }
  0xaf   :  { %1110 = vmatmul.msk.f32.gmra.mxu3 %vm113_vm0, %v52_v2 }
  0xb6   :  { %1093 = vmatmul.msk.f32.gmra.mxu1 %vm113_vm0, %v51_v62  ;;  %1090 = vmatmul.msk.f32.gmra.mxu0 %vm113_vm0, %v52_v2 }
  0xbe   :  { %1094 = vmatmul.msk.f32.gmra.mxu1 %vm113_vm0, %v52_v2 }
 0x10d   :  { %v634_v4 = vpop.f32.mrf.mxu2 }
 0x10e   :  { %v1400_v5 = vmul.f32 0.001953125, %v634_v4 }
 0x110   :  { %v679_v7 = vmul.f32 %v1400_v5, %v634_v4 }
 0x115   :  { %v637_v6 = vpop.f32.mrf.mxu2 }
 0x116   :  { %v1403_v11 = vmul.f32 0.001953125, %v637_v6 }
 0x118   :  { %v680_v18 = vmul.f32 %v1403_v11, %v637_v6 }
 0x11a   :  { %v663_v8 = vpop.f32.mrf.mxu3 }
 0x11b   :  { %v683_v9 = vsub.f32 %v663_v8, %v679_v7  ;;  %v143_v10 = vpop.f32.mrf.mxu0 }
 0x11c   :  { %v1405_v15 = vmul.f32 0.001953125, %v143_v10 }
 0x11d   :  { %v687_v12 = vmul.f32 0.0019569471, %v683_v9  ;;  %v640_v16 = vpop.f32.mrf.mxu2 }
 0x11e   :  { %v188_v19 = vmul.f32 %v1405_v15, %v143_v10  ;;  %v1415_v28 = vmul.f32 0.001953125, %v640_v16 }
 0x11f   :  { %v1407_v17 = vmax.f32 %v687_v12, 0.0 }
 0x120   :  { %v681_v39 = vmul.f32 %v1415_v28, %v640_v16 }
 0x121   :  { %1127 = vrsqrt.f32 %v1407_v17  ;;  %vm702_vm1 = vcmp.eq.f32.partialorder %v1407_v17, inf  ;;  %v705_v12 = vand.u32 2147483648, %v1407_v17  ;;  %vm704_vm2 = vcmp.eq.f32.partialorder %v1407_v17, 0.0 }
 0x122   :  { %v666_v20 = vpop.f32.mrf.mxu3 }
 0x123   :  { %v684_v25 = vsub.f32 %v666_v20, %v680_v18  ;;  %v172_v26 = vpop.f32.mrf.mxu1  ;;  %v146_v27 = vpop.f32.mrf.mxu0 }
 0x124   :  { %v192_v29 = vsub.f32 %v172_v26, %v188_v19  ;;  %v1417_v34 = vmul.f32 0.001953125, %v146_v27 }
 0x125   :  { %v688_v32 = vmul.f32 0.0019569471, %v684_v25  ;;  %v643_v42 = vpop.f32.mrf.mxu2  ;;  %v48_v25 = vld [vmem:[%s2101_s3 + $0x18] sm:$0xff] }
 0x126   :  { %v196_v33 = vmul.f32 0.0019569471, %v192_v29  ;;  %v189_v44 = vmul.f32 %v1417_v34, %v146_v27  ;;  %v1428_v49 = vmul.f32 0.001953125, %v643_v42  ;;  %70 = vperm.xlu2 %1125, %v48_v25  }
 0x127   :  { %v1128_v35 = vpop.eup %1127  ;;  %v1419_v36 = vmax.f32 %v688_v32, 0.0 }
 0x128   :  { %v696_v40 = vmul.f32 %v1128_v35, %v1407_v17  ;;  %v1423_v41 = vmax.f32 %v196_v33, 0.0  ;;  %v682_v58 = vmul.f32 %v1428_v49, %v643_v42 }
 0x129   :  { %1129 = vrsqrt.f32 %v1419_v36  ;;  %vm714_vm9 = vcmp.eq.f32.partialorder %v1419_v36, inf  ;;  %vm716_vm13 = vcmp.eq.f32.partialorder %v1419_v36, 0.0 }
 0x12a   :  { %v697_v43 = vmul.f32 %v1128_v35, %v696_v40  ;;  %1131 = vrsqrt.f32 %v1423_v41  ;;  %v669_v45 = vpop.f32.mrf.mxu3  ;;  %vm211_vm3 = vcmp.eq.f32.partialorder %v1423_v41, inf  ;;  %vm213_vm4 = vcmp.eq.f32.partialorder %v1423_v41, 0.0 }
 0x12b   :  { %v685_v46 = vsub.f32 %v669_v45, %v681_v39  ;;  %v175_v47 = vpop.f32.mrf.mxu1  ;;  %v149_v48 = vpop.f32.mrf.mxu0 }
 0x12c   :  { %v698_v50 = vmul.f32 0.5, %v697_v43  ;;  %v193_v51 = vsub.f32 %v175_v47, %v189_v44  ;;  %v1430_v55 = vmul.f32 0.001953125, %v149_v48 }
 0x12d   :  { %v689_v52 = vmul.f32 0.0019569471, %v685_v46 }
 0x12e   :  { %v699_v53 = vsub.f32 1.5, %v698_v50  ;;  %v197_v54 = vmul.f32 0.0019569471, %v193_v51  ;;  %v190_v3 = vmul.f32 %v1430_v55, %v149_v48  ;;  %v717_v50 = vand.u32 2147483648, %v1419_v36 }
 0x12f   :  { %v1432_v56 = vpop.eup %1129  ;;  %v1434_v57 = vmax.f32 %v689_v52, 0.0  ;;  %v214_v52 = vand.u32 2147483648, %v1423_v41 }
 0x130   :  { %v1132_v61 = vpop.eup %1131  ;;  %v700_v62 = vmul.f32 %v1128_v35, %v699_v53  ;;  %v708_v63 = vmul.f32 %v1432_v56, %v1419_v36  ;;  %v1445_v0 = vmax.f32 %v197_v54, 0.0 }
 0x131   :  { %v205_v1 = vmul.f32 %v1132_v61, %v1423_v41  ;;  %1133 = vrsqrt.f32 %v1434_v57 }
 0x132   :  { %v701_v2 = vmul.f32 %v700_v62, %v1407_v17  ;;  %1135 = vrsqrt.f32 %v1445_v0  ;;  %v672_v4 = vpop.f32.mrf.mxu3  ;;  %v709_v6 = vmul.f32 %v1432_v56, %v708_v63  ;;  %vm223_vm5 = vcmp.eq.f32.partialorder %v1445_v0, inf }
 0x133   :  { %v206_v7 = vmul.f32 %v1132_v61, %v205_v1  ;;  %v686_v8 = vsub.f32 %v672_v4, %v682_v58  ;;  %v178_v9 = vpop.f32.mrf.mxu1  ;;  %v152_v10 = vpop.f32.mrf.mxu0  ;;  %vm225_vm6 = vcmp.eq.f32.partialorder %v1445_v0, 0.0  ;;  %v226_v62 = vand.u32 2147483648, %v1445_v0 }
 0x134   :  { %v194_v16 = vsub.f32 %v178_v9, %v190_v3  ;;  %v1455_v18 = vmul.f32 0.001953125, %v152_v10  ;;  %v703_v19 = vsel %vm702_vm1, %v1407_v17, %v701_v2  ;;  %v710_v32 = vmul.f32 0.5, %v709_v6 }
 0x135   :  { %v207_v20 = vmul.f32 0.5, %v206_v7  ;;  %v690_v21 = vmul.f32 0.0019569471, %v686_v8  ;;  %v706_v24 = vsel %vm704_vm2, %v705_v12, %v703_v19 }
 0x136   :  { %v198_v26 = vmul.f32 0.0019569471, %v194_v16  ;;  %v1462_v27 = vadd.f32 1e-10, %v706_v24  ;;  %v191_v17 = vmul.f32 %v1455_v18, %v152_v10  ;;  %v711_v45 = vsub.f32 1.5, %v710_v32 }
 0x137   :  { %v1464_v29 = vpop.eup %1133  ;;  %v208_v33 = vsub.f32 1.5, %v207_v20  ;;  %v1466_v35 = vmax.f32 %v690_v21, 0.0 }
 0x138   :  { %v1136_v39 = vpop.eup %1135  ;;  %v1468_v40 = vmax.f32 %v198_v26, 0.0  ;;  %1137 = vrcp.f32 %v1462_v27  ;;  %v720_v44 = vmul.f32 %v1464_v29, %v1434_v57  ;;  %v712_v1 = vmul.f32 %v1432_v56, %v711_v45 }
 0x139   :  { %v209_v42 = vmul.f32 %v1132_v61, %v208_v33  ;;  %v217_v43 = vmul.f32 %v1136_v39, %v1445_v0  ;;  %1139 = vrsqrt.f32 %v1466_v35  ;;  %vm752_vm7 = vweird.f32 %v1462_v27 }
 0x13a   :  { %1141 = vrsqrt.f32 %v1468_v40  ;;  %v721_v59 = vmul.f32 %v1464_v29, %v720_v44  ;;  %v756_v8 = vand.u32 2147483647, %v1462_v27  ;;  %v758_v19 = vand.u32 2147483648, %v1462_v27  ;;  %v37_v44 = vld [vmem:[%s2099_s1] sm:$0xff] }
 0x13b   :  { %v210_v46 = vmul.f32 %v209_v42, %v1423_v41  ;;  %v218_v47 = vmul.f32 %v1136_v39, %v217_v43  ;;  %v181_v48 = vpop.f32.mrf.mxu1  ;;  %v713_v25 = vmul.f32 %v712_v1, %v1419_v36  ;;  %vm235_vm11 = vcmp.eq.f32.partialorder %v1468_v40, inf }
 0x13c   :  { %v195_v51 = vsub.f32 %v181_v48, %v191_v17  ;;  %v722_v56 = vmul.f32 0.5, %v721_v59  ;;  %vm1503_vm10 = vcmp.eq.f32.partialorder %v756_v8, 8.507059e+37  ;;  %vm237_vm12 = vcmp.eq.f32.partialorder %v1468_v40, 0.0 }
 0x13d   :  { %v219_v53 = vmul.f32 0.5, %v218_v47  ;;  %v212_v54 = vsel %vm211_vm3, %v1423_v41, %v210_v46  ;;  %v759_v45 = vor.u32 1.1754944e-38, %v758_v19  ;;  %vm738_vm15 = vcmp.eq.f32.partialorder %v1466_v35, inf }
 0x13e   :  { %v1138_v58 = vpop.eup %1137  ;;  %v199_v60 = vmul.f32 0.0019569471, %v195_v51  ;;  %v215_v61 = vsel %vm213_vm4, %v214_v52, %v212_v54  ;;  %v723_v42 = vsub.f32 1.5, %v722_v56  ;;  %vm740_vm2 = vcmp.eq.f32.partialorder %v1466_v35, 0.0 }
 0x13f   :  { %v1140_v63 = vpop.eup %1139  ;;  %v220_v2 = vsub.f32 1.5, %v219_v53  ;;  %v748_v3 = vmul.f32 %v1138_v58, %v1462_v27  ;;  %v1489_v4 = vadd.f32 1e-10, %v215_v61  ;;  %vm753_vm8 = vweird.f32 %v1138_v58 }
 0x140   :  { %v1142_v41 = vpop.eup %1141  ;;  %v732_v6 = vmul.f32 %v1140_v63, %v1466_v35  ;;  %v1492_v7 = vmax.f32 %v199_v60, 0.0  ;;  %vm754_vm14 = vmor %vm752_vm7, %vm753_vm8  ;;  %v238_v53 = vand.u32 2147483648, %v1468_v40 }
 0x141   :  { %v221_v9 = vmul.f32 %v1136_v39, %v220_v2  ;;  %v229_v10 = vmul.f32 %v1142_v41, %v1468_v40  ;;  %v749_v12 = vsub.f32 1.0, %v748_v3  ;;  %1143 = vrcp.f32 %v1489_v4 }
 0x142   :  { %v733_v16 = vmul.f32 %v1140_v63, %v732_v6  ;;  %1145 = vrsqrt.f32 %v1492_v7  ;;  %v267_v8 = vand.u32 2147483648, %v1489_v4  ;;  %vm261_vm1 = vweird.f32 %v1489_v4 }
 0x143   :  { %v222_v20 = vmul.f32 %v221_v9, %v1445_v0  ;;  %v230_v21 = vmul.f32 %v1142_v41, %v229_v10  ;;  %v750_v24 = vmul.f32 %v1138_v58, %v749_v12  ;;  %vm249_vm8 = vcmp.eq.f32.partialorder %v1492_v7, 0.0 }
 0x144   :  { %v734_v26 = vmul.f32 0.5, %v733_v16 }
 0x145   :  { %v231_v33 = vmul.f32 0.5, %v230_v21  ;;  %v751_v39 = vadd.f32 %v1138_v58, %v750_v24  ;;  %v224_v17 = vsel %vm223_vm5, %v1445_v0, %v222_v20  ;;  %vm247_vm5 = vcmp.eq.f32.partialorder %v1492_v7, inf }
 0x146   :  { %v735_v43 = vsub.f32 1.5, %v734_v26  ;;  %v227_v46 = vsel %vm225_vm6, %v226_v62, %v224_v17 }
 0x147   :  { %v1144_v47 = vpop.eup %1143  ;;  %v232_v48 = vsub.f32 1.5, %v231_v33  ;;  %v755_v51 = vsel %vm754_vm14, %v1138_v58, %v751_v39  ;;  %v1520_v52 = vadd.f32 1e-10, %v227_v46  ;;  %v724_v58 = vmul.f32 %v1464_v29, %v723_v42 }
 0x148   :  { %v1146_v54 = vpop.eup %1145  ;;  %v736_v59 = vmul.f32 %v1140_v63, %v735_v43  ;;  %v760_v60 = vsel %vm1503_vm10, %v759_v45, %v755_v51  ;;  %v257_v61 = vmul.f32 %v1144_v47, %v1489_v4  ;;  %v265_v63 = vand.u32 2147483647, %v1489_v4 }
 0x149   :  { %v233_v27 = vmul.f32 %v1142_v41, %v232_v48  ;;  %v241_v0 = vmul.f32 %v1146_v54, %v1492_v7  ;;  %v807_v62 = vmul.f32 %v760_v60, %v37_v44  ;;  %1147 = vrcp.f32 %v1520_v52 }
 0x14a   :  { %v737_v1 = vmul.f32 %v736_v59, %v1466_v35  ;;  %v258_v2 = vsub.f32 1.0, %v257_v61  ;;  %v741_v41 = vand.u32 2147483648, %v1466_v35  ;;  %vm262_vm0 = vweird.f32 %v1144_v47 }
 0x14b   :  { %v234_v3 = vmul.f32 %v233_v27, %v1468_v40  ;;  %v242_v6 = vmul.f32 %v1146_v54, %v241_v0  ;;  %821 = vperm.xlu0 %1126, %v807_v62   ;;  %v715_v29 = vsel %vm714_vm9, %v1419_v36, %v713_v25  ;;  %vm263_vm3 = vmor %vm261_vm1, %vm262_vm0  ;;  %v268_v4 = vor.u32 1.1754944e-38, %v267_v8 }
 0x14c   :  { %v259_v9 = vmul.f32 %v1144_v47, %v258_v2  ;;  %v739_v10 = vsel %vm738_vm15, %v1466_v35, %v737_v1  ;;  %v718_v21 = vsel %vm716_vm13, %v717_v50, %v715_v29  ;;  %vm266_vm4 = vcmp.eq.f32.partialorder %v265_v63, 8.507059e+37 }
 0x14d   :  { %v243_v12 = vmul.f32 0.5, %v242_v6  ;;  %v236_v56 = vsel %vm235_vm11, %v1468_v40, %v234_v3  ;;  %v742_v20 = vsel %vm740_vm2, %v741_v41, %v739_v10  ;;  %v1558_v17 = vadd.f32 1e-10, %v718_v21 }
 0x14e   :  { %v260_v16 = vadd.f32 %v1144_v47, %v259_v9  ;;  %v239_v19 = vsel %vm237_vm12, %v238_v53, %v236_v56  ;;  %v1554_v32 = vadd.f32 1e-10, %v742_v20  ;;  %v725_v36 = vmul.f32 %v724_v58, %v1434_v57  ;;  %v1612_v20 = vld [vmem:[%s2100_s2 + $0x8] sm:$0xff] }
 0x14f   :  { %v1148_v24 = vpop.eup %1147  ;;  %v244_v25 = vsub.f32 1.5, %v243_v12  ;;  %v1552_v26 = vadd.f32 1e-10, %v239_v19  ;;  %v280_v43 = vand.u32 2147483647, %v1520_v52  ;;  %v282_v46 = vand.u32 2147483648, %v1520_v52 }
 0x150   :  { %v264_v33 = vsel %vm263_vm3, %v1144_v47, %v260_v16  ;;  %v272_v35 = vmul.f32 %v1148_v24, %v1520_v52  ;;  %v1565_v47 = vmul.f32 %v807_v62, %v1400_v5  ;;  %v250_v48 = vand.u32 2147483648, %v1492_v7 }
 0x151   :  { %v245_v40 = vmul.f32 %v1146_v54, %v244_v25  ;;  %v269_v39 = vsel %vm266_vm4, %v268_v4, %v264_v33  ;;  %1149 = vrcp.f32 %v1552_v26  ;;  %vm277_vm6 = vweird.f32 %v1148_v24 }
 0x152   :  { %v316_v50 = vmul.f32 %v269_v39, %v37_v44  ;;  %v273_v42 = vsub.f32 1.0, %v272_v35  ;;  %1151 = vrcp.f32 %v1554_v32  ;;  %v1573_v44 = vld [vmem:[%s2100_s2] sm:$0xff]  ;;  %vm276_vm7 = vweird.f32 %v1520_v52 }
 0x153   :  { %v246_v45 = vmul.f32 %v245_v40, %v1492_v7  ;;  %1153 = vrcp.f32 %v1558_v17  ;;  %vm281_vm9 = vcmp.eq.f32.partialorder %v280_v43, 8.507059e+37  ;;  %vm278_vm10 = vmor %vm276_vm7, %vm277_vm6  ;;  %v283_v61 = vor.u32 1.1754944e-38, %v282_v46 }
 0x154   :  { %330 = vperm.xlu1 %1124, %v316_v50   ;;  %v274_v51 = vmul.f32 %v1148_v24, %v273_v42  ;;  %v320_v54 = vmul.f32 %v316_v50, %v1405_v15  ;;  %v815_v27 = vsub.f32 %v1573_v44, %v1565_v47  ;;  %v295_v0 = vand.u32 2147483647, %v1552_v26  ;;  %v1591_v15 = vld [vmem:[%s2099_s1 + $0x8] sm:$0xff] }
 0x155   :  { %v248_v53 = vsel %vm247_vm5, %v1492_v7, %v246_v45  ;;  %vm291_vm11 = vweird.f32 %v1552_v26  ;;  %vm726_vm12 = vcmp.eq.f32.partialorder %v1434_v57, inf  ;;  %v297_v2 = vand.u32 2147483648, %v1552_v26 }
 0x156   :  { %v275_v5 = vadd.f32 %v1148_v24, %v274_v51  ;;  %v251_v59 = vsel %vm249_vm8, %v250_v48, %v248_v53  ;;  %vm797_vm13 = vweird.f32 %v1554_v32  ;;  %v324_v3 = vsub.f32 %v1573_v44, %v320_v54  ;;  %v40_v54 = vld [vmem:[%s2099_s1 + $0x18] sm:$0xff] }
 0x157   :  { %v1150_v60 = vpop.eup %1149  ;;  %v1583_v52 = vadd.f32 1e-10, %v251_v59  ;;  %vm1599_vm15 = vcmp.eq.f32.partialorder %v295_v0, 8.507059e+37  ;;  %v801_v10 = vand.u32 2147483647, %v1554_v32  ;;  %v803_v29 = vand.u32 2147483648, %v1554_v32 }
 0x158   :  { %v279_v62 = vsel %vm278_vm10, %v1148_v24, %v275_v5  ;;  %v287_v7 = vmul.f32 %v1150_v60, %v1552_v26  ;;  %v1152_v58 = vpop.eup %1151  ;;  %vm292_vm14 = vweird.f32 %v1150_v60  ;;  %v727_v19 = vsel %vm726_vm12, %v1434_v57, %v725_v36 }
 0x159   :  { %v284_v1 = vsel %vm281_vm9, %v283_v61, %v279_v62  ;;  %1155 = vrcp.f32 %v1583_v52  ;;  %v793_v8 = vmul.f32 %v1152_v58, %v1554_v32  ;;  %v1154_v41 = vpop.eup %1153  ;;  %v298_v21 = vor.u32 1.1754944e-38, %v297_v2  ;;  %vm293_vm2 = vmor %vm291_vm11, %vm292_vm14 }
 0x15a   :  { %v317_v63 = vmul.f32 %v284_v1, %v1591_v15  ;;  %v288_v6 = vsub.f32 1.0, %v287_v7  ;;  %vm798_vm0 = vweird.f32 %v1152_v58  ;;  %v763_v24 = vmul.f32 %v1154_v41, %v1558_v17 }
 0x15b   :  { %v794_v16 = vsub.f32 1.0, %v793_v8  ;;  %v729_v25 = vand.u32 2147483648, %v1434_v57  ;;  %vm728_vm1 = vcmp.eq.f32.partialorder %v1434_v57, 0.0  ;;  %vm1621_vm3 = vcmp.eq.f32.partialorder %v801_v10, 8.507059e+37  ;;  %v39_v57 = vld [vmem:[%s2099_s1 + $0x10] sm:$0xff]  ;;  %vm799_vm4 = vmor %vm797_vm13, %vm798_vm0 }
 0x15c   :  { %335 = vperm.xlu2 %1125, %v317_v63   ;;  %358 = vperm.xlu1 %1124, %v324_v3   ;;  %v321_v12 = vmul.f32 %v317_v63, %v1417_v34  ;;  %v289_v56 = vmul.f32 %v1150_v60, %v288_v6  ;;  %v804_v39 = vor.u32 1.1754944e-38, %v803_v29  ;;  %v764_v36 = vsub.f32 1.0, %v763_v24 }
 0x15d   :  { %v795_v33 = vmul.f32 %v1152_v58, %v794_v16  ;;  %v730_v50 = vsel %vm728_vm1, %v729_v25, %v727_v19  ;;  %v773_v46 = vand.u32 2147483648, %v1558_v17  ;;  %vm768_vm5 = vweird.f32 %v1154_v41 }
 0x15e   :  { %v325_v4 = vsub.f32 %v1612_v20, %v321_v12  ;;  %v290_v34 = vadd.f32 %v1150_v60, %v289_v56  ;;  %v765_v47 = vmul.f32 %v1154_v41, %v764_v36  ;;  %v745_v48 = vadd.f32 1e-10, %v730_v50 }
 0x15f   :  { %v1156_v35 = vpop.eup %1155  ;;  %v796_v45 = vadd.f32 %v1152_v58, %v795_v33  ;;  %v771_v5 = vand.u32 2147483647, %v1558_v17  ;;  %vm767_vm6 = vweird.f32 %v1558_v17  ;;  %v774_v61 = vor.u32 1.1754944e-38, %v773_v46  ;;  %v44_v33 = vld [vmem:[%s2100_s2 + $0x18] sm:$0xff] }
 0x160   :  { %363 = vperm.xlu0 %1126, %v325_v4   ;;  %v294_v42 = vsel %vm293_vm2, %v1150_v60, %v290_v34  ;;  %v302_v43 = vmul.f32 %v1156_v35, %v1583_v52  ;;  %v766_v60 = vadd.f32 %v1154_v41, %v765_v47  ;;  %1157 = vrcp.f32 %v745_v48  ;;  %vm769_vm7 = vmor %vm767_vm6, %vm768_vm5 }
 0x161   :  { %v299_v26 = vsel %vm1599_vm15, %v298_v21, %v294_v42  ;;  %v800_v53 = vsel %vm799_vm4, %v1152_v58, %v796_v45  ;;  %vm772_vm8 = vcmp.eq.f32.partialorder %v771_v5, 8.507059e+37  ;;  %vm307_vm9 = vweird.f32 %v1156_v35  ;;  %v1662_v42 = vpop.permute.xlu0 %65  ;;  %v1664_v45 = vpop.permute.xlu1 %55 }
 0x162   :  { %v318_v51 = vmul.f32 %v299_v26, %v39_v57  ;;  %v303_v44 = vsub.f32 1.0, %v302_v43  ;;  %v805_v59 = vsel %vm1621_vm3, %v804_v39, %v800_v53  ;;  %v770_v32 = vsel %vm769_vm7, %v1154_v41, %v766_v60 }
 0x163   :  { %v810_v62 = vmul.f32 %v805_v59, %v40_v54  ;;  %v775_v7 = vsel %vm772_vm8, %v774_v61, %v770_v32  ;;  %v312_v3 = vand.u32 2147483648, %v1583_v52  ;;  %vm306_vm10 = vweird.f32 %v1583_v52 }
 0x164   :  { %849 = vperm.xlu2 %1125, %v815_v27   ;;  %340 = vperm.xlu1 %1124, %v318_v51   ;;  %v304_v0 = vmul.f32 %v1156_v35, %v303_v44  ;;  %v808_v2 = vmul.f32 %v775_v7, %v1591_v15  ;;  %v310_v17 = vand.u32 2147483647, %v1583_v52  ;;  %vm308_vm11 = vmor %vm306_vm10, %vm307_vm9  ;;  %v786_v6 = vand.u32 2147483647, %v745_v48  ;;  %v43_v52 = vld [vmem:[%s2100_s2 + $0x10] sm:$0xff]  ;;  %s1295_s2 = smov [#allocation5]  }
 0x165   :  { %v788_v8 = vand.u32 2147483648, %v745_v48  ;;  %v322_v10 = vmul.f32 %v318_v51, %v1430_v55  ;;  %v313_v29 = vor.u32 1.1754944e-38, %v312_v3  ;;  %vm782_vm14 = vweird.f32 %v745_v48  ;;  %s1072_s29 = sshll.u32 %s1295_s2, 4  ;;  %s1073_s29 = int_to_ptr.vmem [resolvable:$true] %s1072_s29 }
 0x166   :  { %v1158_v58 = vpop.eup %1157  ;;  %v305_v1 = vadd.f32 %v1156_v35, %v304_v0  ;;  %vm311_vm13 = vcmp.eq.f32.partialorder %v310_v17, 8.507059e+37  ;;  %vm787_vm0 = vcmp.eq.f32.partialorder %v786_v6, 8.507059e+37  ;;  %v814_v40 = vmul.f32 %v810_v62, %v1428_v49 }
 0x167   :  { %v778_v63 = vmul.f32 %v1158_v58, %v745_v48  ;;  %vm783_vm12 = vweird.f32 %v1158_v58  ;;  %v789_v56 = vor.u32 1.1754944e-38, %v788_v8  ;;  %v326_v19 = vsub.f32 %v43_v52, %v322_v10 }
 0x168   :  { %836 = vperm.xlu0 %1126, %v810_v62   ;;  %v309_v41 = vsel %vm308_vm11, %v1156_v35, %v305_v1  ;;  %vm784_vm15 = vmor %vm782_vm14, %vm783_vm12  ;;  %v812_v39 = vmul.f32 %v808_v2, %v1403_v11  ;;  %v818_v36 = vsub.f32 %v44_v33, %v814_v40 }
 0x169   :  { %v779_v27 = vsub.f32 1.0, %v778_v63  ;;  %v314_v12 = vsel %vm311_vm13, %v313_v29, %v309_v41 }
 0x16a   :  { %v319_v24 = vmul.f32 %v314_v12, %v40_v54  ;;  %v816_v50 = vsub.f32 %v1612_v20, %v812_v39 }
 0x16b   :  { %v780_v9 = vmul.f32 %v1158_v58, %v779_v27 }
 0x16c   :  { %826 = vperm.xlu2 %1125, %v808_v2   ;;  %v323_v34 = vmul.f32 %v319_v24, %v1455_v18 }
 0x16d   :  { %v781_v15 = vadd.f32 %v1158_v58, %v780_v9 }
 0x16e   :  { %v327_v35 = vsub.f32 %v44_v33, %v323_v34 }
 0x16f   :  { %v785_v16 = vsel %vm784_vm15, %v1158_v58, %v781_v15 }
 0x170   :  { %v790_v21 = vsel %vm787_vm0, %v789_v56, %v785_v16 }
 0x171   :  { %v809_v25 = vmul.f32 %v790_v21, %v39_v57 }
 0x173   :  { %831 = vperm.xlu1 %1124, %v809_v25   ;;  %v813_v55 = vmul.f32 %v809_v25, %v1415_v28  ;;  %v1658_v28 = vpop.permute.xlu2 %60 }
 0x174   :  { %368 = vperm.xlu2 %1125, %v326_v19  }
 0x175   :  { %v817_v4 = vsub.f32 %v43_v52, %v813_v55 }
 0x177   :  { %859 = vperm.xlu0 %1126, %v817_v4  }
 0x17b   :  { %373 = vperm.xlu1 %1124, %v327_v35  }
 0x17c   :  { %345 = vperm.xlu2 %1125, %v319_v24  }
 0x180   :  { %v1660_v18 = vpop.permute.xlu2 %70 }
 0x183   :  { %854 = vperm.xlu1 %1124, %v816_v50  }
 0x184   :  { %864 = vperm.xlu2 %1125, %v818_v36  }
 0x1b6   :  { %v336_v43 = vpop.permute.xlu2 %335 }
 0x1b7   :  { %v350_v62 = vmul.f32 %v336_v43, %v1348_v30  ;;  %v351_v7 = vmul.f32 %v336_v43, %v1350_v31 }
 0x1bd   :  { %v822_v46 = vpop.permute.xlu0 %821 }
 0x1be   :  { %v839_v57 = vmul.f32 %v822_v46, %v1332_v13  ;;  %v840_v49 = vmul.f32 %v822_v46, %v1334_v14  ;;  %v850_v11 = vpop.permute.xlu2 %849 }
 0x1c0   :  { %v867_v26 = vadd.f32 %v850_v11, %v839_v57  ;;  %v868_v47 = vadd.f32 %v850_v11, %v840_v49 }
 0x1c2   :  { %v1111_v20 = vmul.f32 -1.442695, %v867_v26  ;;  %v1112_v48 = vmul.f32 -1.442695, %v868_v47  ;;  %v1725_v26 = vld [vmem:[#allocation2 + $0x70] sm:$0xff] }
 0x1c4   :  { %1159 = vpow2.f32 %v1111_v20 }
 0x1c5   :  { %1161 = vpow2.f32 %v1112_v48 }
 0x1c6   :  { %v1668_v51 = vpop.permute.xlu2 %826  ;;  %v331_v44 = vpop.permute.xlu1 %330 }
 0x1c7   :  { %v348_v13 = vmul.f32 %v331_v44, %v1356_v37  ;;  %v349_v14 = vmul.f32 %v331_v44, %v1358_v38  ;;  %v1730_v44 = vld [vmem:[#allocation2 + $0x78] sm:$0xff] }
 0x1ca   :  { %v1160_v53 = vpop.eup %1159 }
 0x1cb   :  { %v1162_v5 = vpop.eup %1161  ;;  %v1670_v54 = vadd.f32 1.0, %v1160_v53 }
 0x1cc   :  { %v1672_v59 = vadd.f32 1.0, %v1162_v5 }
 0x1cd   :  { %1163 = vrcp.f32 %v1670_v54  ;;  %v916_v25 = vand.u32 2147483647, %v1670_v54  ;;  %vm912_vm1 = vweird.f32 %v1670_v54 }
 0x1ce   :  { %v359_v60 = vpop.permute.xlu1 %358  ;;  %v369_v32 = vpop.permute.xlu2 %368  ;;  %1165 = vrcp.f32 %v1672_v59  ;;  %vm927_vm2 = vweird.f32 %v1672_v59  ;;  %v931_v36 = vand.u32 2147483647, %v1672_v59  ;;  %v933_v50 = vand.u32 2147483648, %v1672_v59 }
 0x1cf   :  { %v376_v61 = vadd.f32 %v359_v60, %v348_v13  ;;  %v377_v0 = vadd.f32 %v359_v60, %v349_v14  ;;  %vm1718_vm4 = vcmp.eq.f32.partialorder %v916_v25, 8.507059e+37 }
 0x1d0   :  { %vm1745_vm7 = vcmp.eq.f32.partialorder %v931_v36, 8.507059e+37 }
 0x1d1   :  { %v1095_v58 = vmul.f32 -1.442695, %v376_v61  ;;  %v1096_v1 = vmul.f32 -1.442695, %v377_v0 }
 0x1d2   :  { %v364_v2 = vpop.permute.xlu0 %363 }
 0x1d3   :  { %1167 = vpow2.f32 %v1095_v58  ;;  %v378_v63 = vadd.f32 %v364_v2, %v350_v62  ;;  %v379_v37 = vadd.f32 %v364_v2, %v351_v7  ;;  %v1680_v17 = vpop.eup %1163  ;;  %v934_v58 = vor.u32 1.1754944e-38, %v933_v50  ;;  %v1230_v62 = vld [vmem:[#allocation2] sm:$0xff] }
 0x1d4   :  { %1169 = vpow2.f32 %v1096_v1  ;;  %v1682_v27 = vpop.eup %1165  ;;  %v908_v31 = vmul.f32 %v1680_v17, %v1670_v54  ;;  %vm913_vm3 = vweird.f32 %v1680_v17 }
 0x1d5   :  { %v1097_v38 = vmul.f32 -1.442695, %v378_v63  ;;  %v1098_v3 = vmul.f32 -1.442695, %v379_v37  ;;  %v923_v9 = vmul.f32 %v1682_v27, %v1672_v59  ;;  %vm928_vm5 = vweird.f32 %v1682_v27  ;;  %vm1741_vm6 = vmor %vm912_vm1, %vm913_vm3 }
 0x1d6   :  { %v341_v30 = vpop.permute.xlu1 %340  ;;  %v1686_v8 = vpop.permute.xlu2 %345  ;;  %v909_v52 = vsub.f32 1.0, %v908_v31  ;;  %vm1757_vm8 = vmor %vm927_vm2, %vm928_vm5 }
 0x1d7   :  { %1171 = vpow2.f32 %v1097_v38  ;;  %v352_v29 = vmul.f32 %v341_v30, %v1338_v22  ;;  %v353_v12 = vmul.f32 %v341_v30, %v1340_v23  ;;  %v924_v19 = vsub.f32 1.0, %v923_v9 }
 0x1d8   :  { %1173 = vpow2.f32 %v1098_v3  ;;  %v910_v22 = vmul.f32 %v1680_v17, %v909_v52  ;;  %v918_v23 = vand.u32 2147483648, %v1670_v54 }
 0x1d9   :  { %v1168_v6 = vpop.eup %1167  ;;  %v380_v21 = vadd.f32 %v369_v32, %v352_v29  ;;  %v381_v24 = vadd.f32 %v369_v32, %v353_v12  ;;  %v925_v35 = vmul.f32 %v1682_v27, %v924_v19 }
 0x1da   :  { %v1170_v41 = vpop.eup %1169  ;;  %v1690_v10 = vadd.f32 1.0, %v1168_v6  ;;  %v837_v34 = vpop.permute.xlu0 %836  ;;  %v911_v20 = vadd.f32 %v1680_v17, %v910_v22  ;;  %v919_v60 = vor.u32 1.1754944e-38, %v918_v23 }
 0x1db   :  { %v1693_v15 = vadd.f32 1.0, %v1170_v41  ;;  %v1099_v40 = vmul.f32 -1.442695, %v380_v21  ;;  %v1100_v46 = vmul.f32 -1.442695, %v381_v24  ;;  %v845_v47 = vmul.f32 %v1725_v26, %v837_v34  ;;  %v1795_v21 = vld [vmem:[#allocation2 + $0x30] sm:$0xff] }
 0x1dc   :  { %1175 = vrcp.f32 %v1690_v10  ;;  %v846_v53 = vmul.f32 %v1730_v44, %v837_v34  ;;  %v926_v5 = vadd.f32 %v1682_v27, %v925_v35  ;;  %v915_v63 = vsel %vm1741_vm6, %v1680_v17, %v911_v20 }
 0x1dd   :  { %v1172_v56 = vpop.eup %1171  ;;  %1177 = vrcp.f32 %v1693_v15  ;;  %vm421_vm10 = vweird.f32 %v1690_v10  ;;  %v427_v30 = vand.u32 2147483648, %v1690_v10  ;;  %v442_v6 = vand.u32 2147483648, %v1693_v15 }
 0x1de   :  { %v1174_v16 = vpop.eup %1173  ;;  %v1699_v55 = vadd.f32 1.0, %v1172_v56  ;;  %v865_v57 = vpop.permute.xlu2 %864  ;;  %v930_v3 = vsel %vm1757_vm8, %v1682_v27, %v926_v5  ;;  %v425_v27 = vand.u32 2147483647, %v1690_v10  ;;  %vm436_vm13 = vweird.f32 %v1693_v15  ;;  %v1228_v5 = vld [vmem:[#allocation2 + $0x40] sm:$0xff] }
 0x1df   :  { %v1704_v4 = vadd.f32 1.0, %v1174_v16  ;;  %v873_v14 = vadd.f32 %v865_v57, %v845_v47  ;;  %v874_v61 = vadd.f32 %v865_v57, %v846_v53  ;;  %v440_v12 = vand.u32 2147483647, %v1693_v15  ;;  %v1814_v57 = vld [vmem:[#allocation2 + $0x60] sm:$0xff] }
 0x1e0   :  { %1179 = vrcp.f32 %v1699_v55  ;;  %v920_v52 = vsel %vm1718_vm4, %v919_v60, %v915_v63  ;;  %v935_v16 = vsel %vm1745_vm7, %v934_v58, %v930_v3  ;;  %v443_v35 = vor.u32 1.1754944e-38, %v442_v6  ;;  %v1231_v58 = vld [vmem:[#allocation2 + $0x8] sm:$0xff] }
 0x1e1   :  { %1181 = vrcp.f32 %v1704_v4  ;;  %v1117_v2 = vmul.f32 -1.442695, %v873_v14  ;;  %v1118_v41 = vmul.f32 -1.442695, %v874_v61  ;;  %vm426_vm15 = vcmp.eq.f32.partialorder %v425_v27, 8.507059e+37 }
 0x1e2   :  { %v1706_v33 = vpop.eup %1175  ;;  %1183 = vpow2.f32 %v1099_v40  ;;  %vm441_vm0 = vcmp.eq.f32.partialorder %v440_v12, 8.507059e+37  ;;  %v455_v36 = vand.u32 2147483647, %v1699_v55  ;;  %v472_v20 = vand.u32 2147483648, %v1704_v4 }
 0x1e3   :  { %v1711_v39 = vpop.eup %1177  ;;  %v417_v43 = vmul.f32 %v1706_v33, %v1690_v10  ;;  %1185 = vpow2.f32 %v1100_v46  ;;  %vm422_vm9 = vweird.f32 %v1706_v33  ;;  %v457_v46 = vand.u32 2147483648, %v1699_v55 }
 0x1e4   :  { %v432_v11 = vmul.f32 %v1711_v39, %v1693_v15  ;;  %vm437_vm11 = vweird.f32 %v1711_v39  ;;  %vm1775_vm12 = vmor %vm421_vm10, %vm422_vm9  ;;  %1187 = vpow2.f32 %v1117_v2  ;;  %v1799_v15 = vmul.f32 %v1795_v21, %v1686_v8 }
 0x1e5   :  { %v418_v48 = vsub.f32 1.0, %v417_v43  ;;  %vm1791_vm14 = vmor %vm436_vm13, %vm437_vm11  ;;  %v832_v34 = vpop.permute.xlu1 %831  ;;  %1189 = vpow2.f32 %v1118_v41  ;;  %vm451_vm2 = vweird.f32 %v1699_v55  ;;  %vm1834_vm3 = vcmp.eq.f32.partialorder %v455_v36, 8.507059e+37 }
 0x1e6   :  { %v433_v13 = vsub.f32 1.0, %v432_v11  ;;  %v1735_v0 = vpop.eup %1179  ;;  %v843_v49 = vmul.f32 %v1814_v57, %v832_v34  ;;  %v458_v63 = vor.u32 1.1754944e-38, %v457_v46  ;;  %vm466_vm5 = vweird.f32 %v1704_v4 }
 0x1e7   :  { %v419_v32 = vmul.f32 %v1706_v33, %v418_v48  ;;  %v447_v38 = vmul.f32 %v1735_v0, %v1699_v55  ;;  %v1771_v59 = vpop.eup %1181  ;;  %v1818_v48 = vld [vmem:[#allocation2 + $0x38] sm:$0xff]  ;;  %vm452_vm1 = vweird.f32 %v1735_v0  ;;  %v473_v6 = vor.u32 1.1754944e-38, %v472_v20 }
 0x1e8   :  { %v434_v1 = vmul.f32 %v1711_v39, %v433_v13  ;;  %v1184_v9 = vpop.eup %1183  ;;  %v462_v25 = vmul.f32 %v1771_v59, %v1704_v4  ;;  %v355_v53 = vmul.f32 %v1818_v48, %v1686_v8  ;;  %v1823_v13 = vmul.f32 %v1228_v5, %v920_v52  ;;  %vm1845_vm4 = vmor %vm451_vm2, %vm452_vm1 }
 0x1e9   :  { %v420_v37 = vadd.f32 %v1706_v33, %v419_v32  ;;  %v448_v31 = vsub.f32 1.0, %v447_v38  ;;  %v1186_v56 = vpop.eup %1185  ;;  %v1806_v22 = vadd.f32 1.0, %v1184_v9  ;;  %v1229_v32 = vld [vmem:[#allocation2 + $0x48] sm:$0xff]  ;;  %vm467_vm6 = vweird.f32 %v1771_v59 }
 0x1ea   :  { %v435_v17 = vadd.f32 %v1711_v39, %v434_v1  ;;  %v1808_v23 = vadd.f32 1.0, %v1186_v56  ;;  %v1188_v11 = vpop.eup %1187  ;;  %v463_v47 = vsub.f32 1.0, %v462_v25  ;;  %v1827_v61 = vmul.f32 %v1229_v32, %v935_v16  ;;  %v1233_v32 = vld [vmem:[#allocation2 + $0x10] sm:$0xff] }
 0x1eb   :  { %v424_v19 = vsel %vm1775_vm12, %v1706_v33, %v420_v37  ;;  %v428_v33 = vor.u32 1.1754944e-38, %v427_v30  ;;  %v449_v40 = vmul.f32 %v1735_v0, %v448_v31  ;;  %1191 = vrcp.f32 %v1806_v22  ;;  %v1190_v8 = vpop.eup %1189  ;;  %v1840_v37 = vld [vmem:[#allocation2 + $0x68] sm:$0xff]  ;;  %vm1891_vm12 = vmor %vm466_vm5, %vm467_vm6 }
 0x1ec   :  { %v439_v24 = vsel %vm1791_vm14, %v1711_v39, %v435_v17  ;;  %v860_v39 = vpop.permute.xlu0 %859  ;;  %1193 = vrcp.f32 %v1808_v23  ;;  %v1838_v54 = vadd.f32 1.0, %v1188_v11  ;;  %v844_v38 = vmul.f32 %v1840_v37, %v832_v34  ;;  %v1237_v34 = vld [vmem:[#allocation2 + $0x18] sm:$0xff] }
 0x1ed   :  { %v429_v50 = vsel %vm426_vm15, %v428_v33, %v424_v19  ;;  %v444_v43 = vsel %vm441_vm0, %v443_v35, %v439_v24  ;;  %v450_v14 = vadd.f32 %v1735_v0, %v449_v40  ;;  %v871_v60 = vadd.f32 %v860_v39, %v843_v49  ;;  %v374_v10 = vpop.permute.xlu1 %373 }
 0x1ee   :  { %v1829_v7 = vmul.f32 %v1230_v62, %v429_v50  ;;  %v1831_v1 = vmul.f32 %v1231_v58, %v444_v43  ;;  %v464_v55 = vmul.f32 %v1771_v59, %v463_v47  ;;  %v470_v30 = vand.u32 2147483647, %v1704_v4 }
 0x1ef   :  { %v454_v31 = vsel %vm1845_vm4, %v1735_v0, %v450_v14  ;;  %v872_v9 = vadd.f32 %v860_v39, %v844_v38  ;;  %v1115_v29 = vmul.f32 -1.442695, %v871_v60  ;;  %vm481_vm7 = vweird.f32 %v1806_v22 }
 0x1f0   :  { %v1859_v12 = vmul.f32 %v1829_v7, %v1664_v45  ;;  %v1863_v56 = vmul.f32 %v1831_v1, %v1664_v45  ;;  %v485_v52 = vand.u32 2147483647, %v1806_v22  ;;  %v1868_v19 = vadd.f32 1.0, %v1190_v8 }
 0x1f1   :  { %v1192_v3 = vpop.eup %1191  ;;  %1195 = vrcp.f32 %v1838_v54  ;;  %v459_v24 = vsel %vm1834_vm3, %v458_v63, %v454_v31  ;;  %v465_v25 = vadd.f32 %v1771_v59, %v464_v55  ;;  %vm1874_vm8 = vcmp.eq.f32.partialorder %v470_v30, 8.507059e+37  ;;  %v1234_v63 = vld [vmem:[#allocation2 + $0x20] sm:$0xff]  ;;  %v1235_v31 = vld [vmem:[#allocation2 + $0x28] sm:$0xff] }
 0x1f2   :  { %v477_v41 = vmul.f32 %v1192_v3, %v1806_v22  ;;  %v1194_v27 = vpop.eup %1193  ;;  %vm482_vm9 = vweird.f32 %v1192_v3  ;;  %v487_v33 = vand.u32 2147483648, %v1806_v22  ;;  %1197 = vpow2.f32 %v1115_v29 }
 0x1f3   :  { %v492_v0 = vmul.f32 %v1194_v27, %v1808_v23  ;;  %v1116_v36 = vmul.f32 -1.442695, %v872_v9  ;;  %v500_v39 = vand.u32 2147483647, %v1808_v23  ;;  %v502_v50 = vand.u32 2147483648, %v1808_v23  ;;  %vm483_vm11 = vmor %vm481_vm7, %vm482_vm9 }
 0x1f4   :  { %v478_v16 = vsub.f32 1.0, %v477_v41  ;;  %v382_v43 = vadd.f32 %v374_v10, %v1799_v15  ;;  %v383_v46 = vadd.f32 %v374_v10, %v355_v53  ;;  %vm497_vm10 = vweird.f32 %v1194_v27 }
 0x1f5   :  { %v493_v40 = vsub.f32 1.0, %v492_v0  ;;  %1199 = vrcp.f32 %v1868_v19  ;;  %v488_v47 = vor.u32 1.1754944e-38, %v487_v33  ;;  %vm486_vm13 = vcmp.eq.f32.partialorder %v485_v52, 8.507059e+37 }
 0x1f6   :  { %v479_v35 = vmul.f32 %v1192_v3, %v478_v16  ;;  %1201 = vpow2.f32 %v1116_v36  ;;  %v1101_v20 = vmul.f32 -1.442695, %v382_v43  ;;  %v1102_v5 = vmul.f32 -1.442695, %v383_v46  ;;  %v1921_v16 = vld [vmem:[#allocation2 + $0x50] sm:$0xff] }
 0x1f7   :  { %v494_v11 = vmul.f32 %v1194_v27, %v493_v40  ;;  %v1885_v14 = vpop.eup %1195  ;;  %vm496_vm14 = vweird.f32 %v1808_v23  ;;  %v469_v22 = vsel %vm1891_vm12, %v1771_v59, %v465_v25  ;;  %v1899_v62 = vmul.f32 %v1233_v32, %v459_v24  ;;  %v855_v25 = vpop.permute.xlu1 %854 }
 0x1f8   :  { %v480_v49 = vadd.f32 %v1192_v3, %v479_v35  ;;  %vm498_vm15 = vmor %vm496_vm14, %vm497_vm10  ;;  %v503_v4 = vor.u32 1.1754944e-38, %v502_v50  ;;  %v1198_v8 = vpop.eup %1197  ;;  %vm501_vm0 = vcmp.eq.f32.partialorder %v500_v39, 8.507059e+37  ;;  %1203 = vpow2.f32 %v1101_v20 }
 0x1f9   :  { %v495_v60 = vadd.f32 %v1194_v27, %v494_v11  ;;  %v998_v23 = vmul.f32 %v1885_v14, %v1838_v54  ;;  %v1904_v17 = vadd.f32 1.0, %v1198_v8  ;;  %1205 = vpow2.f32 %v1102_v5 }
 0x1fa   :  { %v484_v53 = vsel %vm483_vm11, %v1192_v3, %v480_v49  ;;  %v552_v55 = vsub.f32 %v1829_v7, %v1859_v12  ;;  %v474_v30 = vsel %vm1874_vm8, %v473_v6, %v469_v22  ;;  %v1919_v52 = vmul.f32 %v1827_v61, %v1664_v45  ;;  %v1940_v49 = vld [vmem:[#allocation2 + $0x58] sm:$0xff] }
 0x1fb   :  { %v489_v58 = vsel %vm486_vm13, %v488_v47, %v484_v53  ;;  %v499_v2 = vsel %vm498_vm15, %v1194_v27, %v495_v60  ;;  %v1906_v59 = vpop.eup %1199  ;;  %v1915_v27 = vmul.f32 %v1823_v13, %v1664_v45  ;;  %v841_v7 = vmul.f32 %v1921_v16, %v1668_v51 }
 0x1fc   :  { %v540_v38 = vmul.f32 %v1234_v63, %v489_v58  ;;  %v504_v3 = vsel %vm501_vm0, %v503_v4, %v499_v2  ;;  %v1202_v29 = vpop.eup %1201  ;;  %1207 = vrcp.f32 %v1904_v17  ;;  %v553_v6 = vsub.f32 %v1831_v1, %v1863_v56 }
 0x1fd   :  { %v541_v41 = vmul.f32 %v1235_v31, %v504_v3  ;;  %v1929_v33 = vmul.f32 %v1237_v34, %v474_v30  ;;  %v1933_v45 = vmul.f32 %v1899_v62, %v1658_v28  ;;  %v999_v35 = vsub.f32 1.0, %v998_v23 }
 0x1fe   :  { %v548_v9 = vmul.f32 %v540_v38, %v1662_v42  ;;  %v1935_v40 = vadd.f32 1.0, %v1202_v29  ;;  %v1204_v36 = vpop.eup %1203  ;;  %v1013_v43 = vmul.f32 %v1906_v59, %v1868_v19  ;;  %v842_v11 = vmul.f32 %v1940_v49, %v1668_v51 }
 0x1ff   :  { %v549_v0 = vmul.f32 %v541_v41, %v1662_v42  ;;  %v1206_v46 = vpop.eup %1205  ;;  %v869_v47 = vadd.f32 %v855_v25, %v841_v7  ;;  %v1043_v20 = vsub.f32 %v1823_v13, %v1915_v27  ;;  %v1008_v15 = vand.u32 2147483648, %v1838_v54 }
 0x200   :  { %v556_v10 = vsub.f32 %v540_v38, %v548_v9  ;;  %v564_v24 = vadd.f32 %v552_v55, %v548_v9  ;;  %1209 = vrcp.f32 %v1935_v40  ;;  %v1953_v60 = vmul.f32 %v1929_v33, %v1658_v28 }
 0x201   :  { %v557_v39 = vsub.f32 %v541_v41, %v549_v0  ;;  %v565_v1 = vadd.f32 %v553_v6, %v549_v0  ;;  %v1000_v51 = vmul.f32 %v1885_v14, %v999_v35  ;;  %v1956_v22 = vadd.f32 1.0, %v1204_v36 }
 0x202   :  { %v560_v50 = vadd.f32 %v556_v10, %v1859_v12  ;;  %572 = vst [vmem:[#allocation5 + $0x20] sm:$0xff] %v564_v24  ;;  %v1044_v12 = vsub.f32 %v1827_v61, %v1919_v52  ;;  %v1208_v53 = vpop.eup %1207  ;;  %v1958_v32 = vadd.f32 1.0, %v1206_v46  ;;  %v554_v58 = vsub.f32 %v1899_v62, %v1933_v45 }
 0x203   :  { %v561_v5 = vadd.f32 %v557_v39, %v1863_v56  ;;  %573 = vst [vmem:[#allocation5 + $0x28] sm:$0xff] %v565_v1  ;;  %v1006_v56 = vand.u32 2147483647, %v1838_v54  ;;  %v1014_v4 = vsub.f32 1.0, %v1013_v43  ;;  %v968_v8 = vmul.f32 %v1208_v53, %v1904_v17 }
 0x204   :  { %568 = vst [vmem:[#allocation5] sm:$0xff] %v560_v50  ;;  %v976_v2 = vand.u32 2147483647, %v1904_v17  ;;  %v978_v63 = vand.u32 2147483648, %v1904_v17  ;;  %1211 = vrcp.f32 %v1956_v22  ;;  %v1113_v38 = vmul.f32 -1.442695, %v869_v47 }
 0x205   :  { %569 = vst [vmem:[#allocation5 + $0x8] sm:$0xff] %v561_v5  ;;  %v1967_v3 = vor.u32 1.1754944e-38, %v1008_v15  ;;  %v969_v23 = vsub.f32 1.0, %v968_v8  ;;  %1213 = vrcp.f32 %v1958_v32  ;;  %v870_v55 = vadd.f32 %v855_v25, %v842_v11 }
 0x206   :  { %v1210_v30 = vpop.eup %1209  ;;  %v1971_v31 = vadd.f32 %v1885_v14, %v1000_v51  ;;  %vm1003_vm1 = vweird.f32 %v1885_v14  ;;  %v991_v41 = vand.u32 2147483647, %v1935_v40  ;;  %v993_v9 = vand.u32 2147483648, %v1935_v40 }
 0x207   :  { %v1977_v29 = vmul.f32 %v1906_v59, %v1014_v4  ;;  %v970_v7 = vmul.f32 %v1208_v53, %v969_v23  ;;  %vm973_vm2 = vweird.f32 %v1208_v53  ;;  %v983_v6 = vmul.f32 %v1210_v30, %v1935_v40 }
 0x208   :  { %vm1002_vm3 = vweird.f32 %v1838_v54  ;;  %vm972_vm4 = vweird.f32 %v1904_v17  ;;  %vm1982_vm5 = vcmp.eq.f32.partialorder %v976_v2, 8.507059e+37  ;;  %v979_v10 = vor.u32 1.1754944e-38, %v978_v63 }
 0x209   :  { %1215 = vpow2.f32 %v1113_v38  ;;  %v971_v24 = vadd.f32 %v1208_v53, %v970_v7  ;;  %v984_v25 = vsub.f32 1.0, %v983_v6  ;;  %vm987_vm6 = vweird.f32 %v1935_v40  ;;  %vm974_vm7 = vmor %vm972_vm4, %vm973_vm2 }
 0x20a   :  { %v1114_v34 = vmul.f32 -1.442695, %v870_v55  ;;  %v1212_v35 = vpop.eup %1211  ;;  %vm1987_vm8 = vcmp.eq.f32.partialorder %v991_v41, 8.507059e+37  ;;  %v994_v39 = vor.u32 1.1754944e-38, %v993_v9  ;;  %vm511_vm9 = vweird.f32 %v1956_v22  ;;  %vm2018_vm2 = vmor %vm1002_vm3, %vm1003_vm1 }
 0x20b   :  { %v515_v17 = vand.u32 2147483647, %v1956_v22  ;;  %v1214_v50 = vpop.eup %1213  ;;  %v975_v1 = vsel %vm974_vm7, %v1208_v53, %v971_v24  ;;  %v985_v43 = vmul.f32 %v1210_v30, %v984_v25  ;;  %vm988_vm10 = vweird.f32 %v1210_v30 }
 0x20c   :  { %v507_v46 = vmul.f32 %v1212_v35, %v1956_v22  ;;  %v980_v11 = vsel %vm1982_vm5, %v979_v10, %v975_v1  ;;  %v517_v47 = vand.u32 2147483648, %v1956_v22  ;;  %v522_v5 = vmul.f32 %v1214_v50, %v1958_v32  ;;  %vm989_vm12 = vmor %vm987_vm6, %vm988_vm10 }
 0x20d   :  { %1217 = vpow2.f32 %v1114_v34  ;;  %v986_v15 = vadd.f32 %v1210_v30, %v985_v43  ;;  %v1031_v51 = vmul.f32 %v1814_v57, %v980_v11  ;;  %vm526_vm11 = vweird.f32 %v1958_v32 }
 0x20e   :  { %v508_v4 = vsub.f32 1.0, %v507_v46  ;;  %vm512_vm13 = vweird.f32 %v1212_v35  ;;  %v523_v53 = vsub.f32 1.0, %v522_v5  ;;  %v530_v2 = vand.u32 2147483647, %v1958_v32 }
 0x20f   :  { %v1216_v8 = vpop.eup %1215  ;;  %v532_v63 = vand.u32 2147483648, %v1958_v32  ;;  %v990_v38 = vsel %vm989_vm12, %v1210_v30, %v986_v15  ;;  %v1039_v23 = vmul.f32 %v1031_v51, %v1662_v42  ;;  %vm1017_vm14 = vweird.f32 %v1868_v19  ;;  %vm513_vm4 = vmor %vm511_vm9, %vm512_vm13 }
 0x210   :  { %v509_v55 = vmul.f32 %v1212_v35, %v508_v4  ;;  %v2005_v41 = vadd.f32 1.0, %v1216_v8  ;;  %v995_v57 = vsel %vm1987_vm8, %v994_v39, %v990_v38  ;;  %vm2010_vm15 = vcmp.eq.f32.partialorder %v515_v17, 8.507059e+37 }
 0x211   :  { %v524_v9 = vmul.f32 %v1214_v50, %v523_v53  ;;  %vm527_vm0 = vweird.f32 %v1214_v50  ;;  %v1032_v7 = vmul.f32 %v1840_v37, %v995_v57  ;;  %v1047_v6 = vsub.f32 %v1031_v51, %v1039_v23 }
 0x212   :  { %v1055_v0 = vadd.f32 %v1043_v20, %v1039_v23  ;;  %v510_v10 = vadd.f32 %v1212_v35, %v509_v55  ;;  %v518_v25 = vor.u32 1.1754944e-38, %v517_v47  ;;  %v533_v36 = vor.u32 1.1754944e-38, %v532_v63  ;;  %vm528_vm1 = vmor %vm526_vm11, %vm527_vm0 }
 0x213   :  { %v1218_v24 = vpop.eup %1217  ;;  %v525_v34 = vadd.f32 %v1214_v50, %v524_v9  ;;  %1219 = vrcp.f32 %v2005_v41  ;;  %v1040_v39 = vmul.f32 %v1032_v7, %v1662_v42  ;;  %v1051_v37 = vadd.f32 %v1047_v6, %v1915_v27 }
 0x214   :  { %1064 = vst [vmem:[#allocation5 + $0x60] sm:$0xff] %v1055_v0  ;;  %v514_v17 = vsel %vm513_vm4, %v1212_v35, %v510_v10  ;;  %v2035_v13 = vadd.f32 1.0, %v1218_v24  ;;  %v1005_v20 = vsel %vm2018_vm2, %v1885_v14, %v1971_v31  ;;  %vm531_vm3 = vcmp.eq.f32.partialorder %v530_v2, 8.507059e+37 }
 0x215   :  { %v519_v22 = vsel %vm2010_vm15, %v518_v25, %v514_v17  ;;  %v529_v1 = vsel %vm528_vm1, %v1214_v50, %v525_v34  ;;  %v1048_v42 = vsub.f32 %v1032_v7, %v1040_v39  ;;  %v1056_v27 = vadd.f32 %v1044_v12, %v1040_v39  ;;  %1060 = vst [vmem:[#allocation5 + $0x40] sm:$0xff] %v1051_v37 }
 0x216   :  { %v534_v32 = vsel %vm531_vm3, %v533_v36, %v529_v1  ;;  %v542_v35 = vmul.f32 %v1795_v21, %v519_v22  ;;  %v1016_v43 = vadd.f32 %v1906_v59, %v1977_v29  ;;  %vm1018_vm5 = vweird.f32 %v1906_v59 }
 0x217   :  { %v543_v14 = vmul.f32 %v1818_v48, %v534_v32  ;;  %1221 = vrcp.f32 %v2035_v13  ;;  %vm1007_vm6 = vcmp.eq.f32.partialorder %v1006_v56, 8.507059e+37  ;;  %v1023_v31 = vand.u32 2147483648, %v1868_v19  ;;  %1065 = vst [vmem:[#allocation5 + $0x68] sm:$0xff] %v1056_v27  ;;  %vm2064_vm7 = vmor %vm1017_vm14, %vm1018_vm5 }
 0x218   :  { %v1052_v61 = vadd.f32 %v1048_v42, %v1919_v52  ;;  %v550_v12 = vmul.f32 %v542_v35, %v1660_v18  ;;  %v555_v29 = vsub.f32 %v1929_v33, %v1953_v60  ;;  %v1010_v50 = vsel %vm1007_vm6, %v1967_v3, %v1005_v20 }
 0x219   :  { %v1220_v21 = vpop.eup %1219  ;;  %v1021_v48 = vand.u32 2147483647, %v1868_v19  ;;  %v551_v46 = vmul.f32 %v543_v14, %v1660_v18  ;;  %v1020_v3 = vsel %vm2064_vm7, %v1906_v59, %v1016_v43  ;;  %v1024_v5 = vor.u32 1.1754944e-38, %v1023_v31 }
 0x21a   :  { %1061 = vst [vmem:[#allocation5 + $0x48] sm:$0xff] %v1052_v61  ;;  %v558_v52 = vsub.f32 %v542_v35, %v550_v12  ;;  %v566_v56 = vadd.f32 %v554_v58, %v550_v12  ;;  %v938_v33 = vmul.f32 %v1220_v21, %v2005_v41  ;;  %v1033_v19 = vmul.f32 %v1725_v26, %v1010_v50 }
 0x21b   :  { %v559_v11 = vsub.f32 %v543_v14, %v551_v46  ;;  %v567_v47 = vadd.f32 %v555_v29, %v551_v46  ;;  %vm1022_vm8 = vcmp.eq.f32.partialorder %v1021_v48, 8.507059e+37  ;;  %v946_v58 = vand.u32 2147483647, %v2005_v41 }
 0x21c   :  { %v562_v15 = vadd.f32 %v558_v52, %v1933_v45  ;;  %574 = vst [vmem:[#allocation5 + $0x30] sm:$0xff] %v566_v56  ;;  %v939_v51 = vsub.f32 1.0, %v938_v33  ;;  %v948_v8 = vand.u32 2147483648, %v2005_v41  ;;  %v1025_v53 = vsel %vm1022_vm8, %v1024_v5, %v1020_v3 }
 0x21d   :  { %v1222_v4 = vpop.eup %1221  ;;  %v563_v62 = vadd.f32 %v559_v11, %v1953_v60  ;;  %575 = vst [vmem:[#allocation5 + $0x38] sm:$0xff] %v567_v47  ;;  %vm943_vm9 = vweird.f32 %v1220_v21  ;;  %v1041_v26 = vmul.f32 %v1033_v19, %v1660_v18  ;;  %vm942_vm10 = vweird.f32 %v2005_v41 }
 0x21e   :  { %570 = vst [vmem:[#allocation5 + $0x10] sm:$0xff] %v562_v15  ;;  %v940_v59 = vmul.f32 %v1220_v21, %v939_v51  ;;  %v953_v2 = vmul.f32 %v1222_v4, %v2035_v13  ;;  %v1034_v60 = vmul.f32 %v1730_v44, %v1025_v53  ;;  %vm944_vm11 = vmor %vm942_vm10, %vm943_vm9  ;;  %vm947_vm12 = vcmp.eq.f32.partialorder %v946_v58, 8.507059e+37 }
 0x21f   :  { %571 = vst [vmem:[#allocation5 + $0x18] sm:$0xff] %v563_v62  ;;  %v949_v38 = vor.u32 1.1754944e-38, %v948_v8  ;;  %v963_v23 = vand.u32 2147483648, %v2035_v13  ;;  %vm958_vm13 = vweird.f32 %v1222_v4  ;;  %v961_v40 = vand.u32 2147483647, %v2035_v13 }
 0x220   :  { %v941_v45 = vadd.f32 %v1220_v21, %v940_v59  ;;  %v954_v63 = vsub.f32 1.0, %v953_v2  ;;  %vm957_vm14 = vweird.f32 %v2035_v13  ;;  %v1049_v41 = vsub.f32 %v1033_v19, %v1041_v26 }
 0x221   :  { %vm959_vm15 = vmor %vm957_vm14, %vm958_vm13  ;;  %v964_v6 = vor.u32 1.1754944e-38, %v963_v23  ;;  %v1042_v44 = vmul.f32 %v1034_v60, %v1660_v18  ;;  %vm962_vm0 = vcmp.eq.f32.partialorder %v961_v40, 8.507059e+37 }
 0x222   :  { %v945_v55 = vsel %vm944_vm11, %v1220_v21, %v941_v45  ;;  %v955_v57 = vmul.f32 %v1222_v4, %v954_v63 }
 0x223   :  { %v950_v9 = vsel %vm947_vm12, %v949_v38, %v945_v55  ;;  %v1050_v39 = vsub.f32 %v1034_v60, %v1042_v44 }
 0x224   :  { %v956_v30 = vadd.f32 %v1222_v4, %v955_v57  ;;  %v1029_v7 = vmul.f32 %v1921_v16, %v950_v9 }
 0x226   :  { %v960_v0 = vsel %vm959_vm15, %v1222_v4, %v956_v30  ;;  %v1037_v10 = vmul.f32 %v1029_v7, %v1658_v28 }
 0x227   :  { %v965_v24 = vsel %vm962_vm0, %v964_v6, %v960_v0 }
 0x228   :  { %v1030_v25 = vmul.f32 %v1940_v49, %v965_v24  ;;  %v1045_v34 = vsub.f32 %v1029_v7, %v1037_v10  ;;  %v1053_v36 = vadd.f32 %v1049_v41, %v1037_v10 }
 0x22a   :  { %v1038_v37 = vmul.f32 %v1030_v25, %v1658_v28  ;;  %v1057_v17 = vadd.f32 %v1045_v34, %v1041_v26  ;;  %1062 = vst [vmem:[#allocation5 + $0x50] sm:$0xff] %v1053_v36 }
 0x22c   :  { %v1046_v18 = vsub.f32 %v1030_v25, %v1038_v37  ;;  %v1054_v16 = vadd.f32 %v1050_v39, %v1038_v37  ;;  %1066 = vst [vmem:[#allocation5 + $0x70] sm:$0xff] %v1057_v17 }
 0x22e   :  { %v1058_v13 = vadd.f32 %v1046_v18, %v1042_v44  ;;  %1063 = vst [vmem:[#allocation5 + $0x58] sm:$0xff] %v1054_v16 }
 0x230   :  { %1067 = vst [vmem:[#allocation5 + $0x78] sm:$0xff] %v1058_v13 }
 0x231   :  { %1080 = dma.vmem_to_hbm [thread:$0]  %s1073_s29, 2048, %s1075_s4, [#allocation4], %s1292_s23, %s1292_s23, %s1293_s24  }
 0x232   :  { %1289 = dma.done.wait [#allocation4], 2048  }
 0x233   :  { %1290 = vsyncadd [#allocation4], 4294965248 }
 0x234   :  { %1085 = vsyncpa [#allocation3], 1 }
 0x235   :  { %1086 = vsyncpa [#allocation4], 1 }

</bundles_post_ra>
